<compile_context>
chip_gen: v7x
topology: tpu7x:2x2x1
jax: 0.10.0
libtpu: 0.0.40
codegen_flags: <defaults>
</compile_context>

<pallas_src>
import functools

import jax
import jax.numpy as jnp
from jax import lax
from jax.experimental import pallas as pl
from jax.experimental.pallas import tpu as pltpu

# ---------------- synthetic config (small) ----------------
BATCH = 2
IM_C, IM_H, IM_W = 3, 32, 32
FEAT_STRIDE = 8                 # total stride of synthetic backbone
DOUT_BASE = 32                  # dout_base_model
RPN_DIN = 32                    # cfg.MODEL.RPN_CIN
RCNN_DIN = 64                   # cfg.MODEL.RCNN_CIN
RCNN_LAST = 64                  # cfg.MODEL.RCNN_LAST
N_CLASSES = 4
POOL = 4                        # cfg.POOLING_SIZE
ANCHOR_SCALES = (2.0, 4.0, 8.0)
NUM_ANCHORS = len(ANCHOR_SCALES)
POST_NMS_TOPN = 8               # rois per image kept by the proposal layer
SAMPLING_RATIO = 2              # ROIAlignLayer(..., 2)

CPAD = 128                      # lane-dense output-channel padding for Pallas matmuls
TM_MAX = 256                    # max M tile of the conv matmuls (parallel grid axis)

# synthetic backbone channel plan (real, un-padded counts)
BASE1_COUT = 16
BASE2_COUT = 24
BASE3_COUT = DOUT_BASE


def _ceil16(c):
    return ((c + 15) // 16) * 16


def _pick_tm(M, tmax=TM_MAX):
    """Largest M tile <= tmax that divides M, is a multiple of 16, and (if possible)
    yields >= 2 grid steps so the 'parallel' axis actually shards across v7x's 2 TCs."""
    if M % 16 != 0:
        return M                               # fall back: single full block
    tm = min(tmax, M)
    if M // tm < 2 and M >= 32:
        tm = M // 2
    tm = max(16, (tm // 16) * 16)
    while M % tm:
        tm -= 16
    return tm


# ======================= Pallas kernels =======================
def _conv_kernel(col_ref, w_ref, b_ref, o_ref, *, relu):
    """One M-tile of an im2col conv: bf16 MXU matmul, f32 accum, fused bias(+ReLU),
    bf16 lane-dense store."""
    acc = jnp.dot(col_ref[...], w_ref[...], preferred_element_type=jnp.float32)
    acc = acc + b_ref[...]
    if relu:
        acc = jnp.maximum(acc, 0.0)
    o_ref[...] = acc.astype(o_ref.dtype)


def _rpn_kernel(col_ref, wc_ref, bc_ref, wh_ref, bh_ref, o_ref, *, n_anchors):
    """Fused RPN: 3x3 conv (+ReLU) -> concatenated 1x1 heads -> fg sigmoid.

    Head weight columns are laid out [fg-bg logit (A) | bbox deltas (4A) | zeros],
    so sigmoid of the first A columns equals the reference 2-way-softmax fg prob.
    """
    feat = jnp.dot(col_ref[...], wc_ref[...], preferred_element_type=jnp.float32)
    feat = jnp.maximum(feat + bc_ref[...], 0.0)                     # rpn_feat, VMEM only
    scores = jnp.dot(feat.astype(jnp.bfloat16), wh_ref[...],
                     preferred_element_type=jnp.float32) + bh_ref[...]
    lane = lax.broadcasted_iota(jnp.int32, scores.shape, 1)
    fg_prob = 1.0 / (1.0 + jnp.exp(-scores))                        # EUP exp
    o_ref[...] = jnp.where(lane < n_anchors, fg_prob, scores)       # lane-dense store


def _rcnn_head_kernel(pooled_ref, fc6w_ref, fc6b_ref, fc7w_ref, fc7b_ref,
                      hw_ref, hb_ref, o_ref, *, n_classes):
    """Fused RCNN tail: fc6 -> fc7 -> [cls|bbox] heads -> masked softmax.

    One lane-dense (tm, 128) output packs [cls_prob(n_classes) | bbox_pred(4*n) | 0].
    """
    h = jnp.dot(pooled_ref[...].astype(jnp.bfloat16), fc6w_ref[...],
                preferred_element_type=jnp.float32) + fc6b_ref[...]
    h = jnp.maximum(h, 0.0)
    h = jnp.dot(h.astype(jnp.bfloat16), fc7w_ref[...],
                preferred_element_type=jnp.float32) + fc7b_ref[...]
    h = jnp.maximum(h, 0.0)
    scores = jnp.dot(h.astype(jnp.bfloat16), hw_ref[...],
                     preferred_element_type=jnp.float32) + hb_ref[...]

    # Masked softmax over the first n_classes lanes only (other lanes keep raw values).
    lane = lax.broadcasted_iota(jnp.int32, scores.shape, 1)
    is_cls = lane < n_classes
    masked = jnp.where(is_cls, scores, -1e30)
    m = jnp.max(masked, axis=-1, keepdims=True)
    e = jnp.exp(masked - m)
    denom = jnp.sum(e, axis=-1, keepdims=True)
    probs = e / denom                                               # exact (review note)
    o_ref[...] = jnp.where(is_cls, probs, scores)


# ======================= conv wrapper (NHWC im2col, no transposes) =======================
def _im2col_nhwc(x, kh, kw, stride, pad):
    B, H, W, C = x.shape
    xp = jnp.pad(x, ((0, 0), (pad, pad), (pad, pad), (0, 0)))
    Ho = (H + 2 * pad - kh) // stride + 1
    Wo = (W + 2 * pad - kw) // stride + 1
    taps = []
    for i in range(kh):
        for j in range(kw):
            taps.append(xp[:, i:i + stride * (Ho - 1) + 1:stride,
                           j:j + stride * (Wo - 1) + 1:stride, :])
    col = jnp.stack(taps, axis=3)                                   # (B,Ho,Wo,kh*kw,C)
    return col.reshape(B * Ho * Wo, kh * kw * C), Ho, Wo


def conv2d_nhwc(x, w_packed, b_packed, kh, kw, stride, pad, relu=True):
    """x: (B,H,W,Cin_pad) bf16 -> (B,Ho,Wo,CPAD) bf16.
    w_packed: (kh*kw*Cin_pad, CPAD) bf16, b_packed: (1, CPAD) f32."""
    B = x.shape[0]
    col, Ho, Wo = _im2col_nhwc(x, kh, kw, stride, pad)               # bf16, small K
    M, K = col.shape
    N = w_packed.shape[1]
    tm = _pick_tm(M)
    out = pl.pallas_call(
        functools.partial(_conv_kernel, relu=relu),
        out_shape=jax.ShapeDtypeStruct((M, N), jnp.bfloat16),
        grid=(M // tm,),
        in_specs=[
            pl.BlockSpec((tm, K), lambda i: (i, 0)),
            pl.BlockSpec((K, N), lambda i: (0, 0)),
            pl.BlockSpec((1, N), lambda i: (0, 0)),
        ],
        out_specs=pl.BlockSpec((tm, N), lambda i: (i, 0)),
        compiler_params=pltpu.CompilerParams(dimension_semantics=("parallel",)),
    )(col, w_packed, b_packed)
    return out.reshape(B, Ho, Wo, N)


# ======================= RPN proposal glue (plain JAX) =======================
def make_anchors(Hf, Wf):
    sizes = jnp.asarray(ANCHOR_SCALES, jnp.float32) * FEAT_STRIDE
    ys = (jnp.arange(Hf, dtype=jnp.float32) + 0.5) * FEAT_STRIDE
    xs = (jnp.arange(Wf, dtype=jnp.float32) + 0.5) * FEAT_STRIDE
    cy, cx = jnp.meshgrid(ys, xs, indexing="ij")
    cy = cy[:, :, None]
    cx = cx[:, :, None]
    half = (sizes / 2.0)[None, None, :]
    anchors = jnp.stack([cx - half, cy - half, cx + half, cy + half], axis=-1)
    return anchors.reshape(-1, 4)                                   # (Hf*Wf*A, 4)


def bbox_transform_inv(boxes, deltas):
    w = boxes[..., 2] - boxes[..., 0] + 1.0
    h = boxes[..., 3] - boxes[..., 1] + 1.0
    cx = boxes[..., 0] + 0.5 * w
    cy = boxes[..., 1] + 0.5 * h
    dx, dy, dw, dh = (deltas[..., 0], deltas[..., 1], deltas[..., 2], deltas[..., 3])
    pcx = dx * w + cx
    pcy = dy * h + cy
    pw = jnp.exp(dw) * w
    ph = jnp.exp(dh) * h
    return jnp.stack([pcx - 0.5 * pw, pcy - 0.5 * ph,
                      pcx + 0.5 * pw, pcy + 0.5 * ph], axis=-1)


def clip_boxes(boxes, im_info):
    h = im_info[:, 0][:, None]
    w = im_info[:, 1][:, None]
    x1 = jnp.clip(boxes[..., 0], 0.0, w - 1.0)
    y1 = jnp.clip(boxes[..., 1], 0.0, h - 1.0)
    x2 = jnp.clip(boxes[..., 2], 0.0, w - 1.0)
    y2 = jnp.clip(boxes[..., 3], 0.0, h - 1.0)
    return jnp.stack([x1, y1, x2, y2], axis=-1)


def rcnn_rpn(packed, base_feat, im_info):
    B, Hf, Wf, _ = base_feat.shape
    A = NUM_ANCHORS
    cin = _ceil16(DOUT_BASE)
    x = base_feat[..., :cin]                                         # exact: pad lanes are 0
    col, _, _ = _im2col_nhwc(x, 3, 3, 1, 1)                          # (B*Hf*Wf, 9*cin) bf16
    M, K = col.shape
    tm = _pick_tm(M)
    out = pl.pallas_call(
        functools.partial(_rpn_kernel, n_anchors=A),
        out_shape=jax.ShapeDtypeStruct((M, CPAD), jnp.float32),
        grid=(M // tm,),
        in_specs=[
            pl.BlockSpec((tm, K), lambda i: (i, 0)),
            pl.BlockSpec((K, CPAD), lambda i: (0, 0)),
            pl.BlockSpec((1, CPAD), lambda i: (0, 0)),
            pl.BlockSpec((CPAD, CPAD), lambda i: (0, 0)),
            pl.BlockSpec((1, CPAD), lambda i: (0, 0)),
        ],
        out_specs=pl.BlockSpec((tm, CPAD), lambda i: (i, 0)),
        compiler_params=pltpu.CompilerParams(dimension_semantics=("parallel",)),
    )(col, packed["rpn_conv_w"], packed["rpn_conv_b"],
      packed["rpn_head_w"], packed["rpn_head_b"])

    out = out.reshape(B, Hf, Wf, CPAD)
    fg_prob = out[..., :A].reshape(B, Hf * Wf * A)                   # sigmoid(fg - bg)
    deltas = out[..., A:A + 4 * A].reshape(B, Hf * Wf * A, 4)
    anchors = make_anchors(Hf, Wf)[None]
    proposals = clip_boxes(bbox_transform_inv(anchors, deltas), im_info)

    # TODO(synk): NMS + pre-NMS score filtering of the proposal layer are skipped;
    # plain top-K by foreground score is used instead.
    _, top_idx = lax.top_k(fg_prob, POST_NMS_TOPN)
    sel = jnp.take_along_axis(proposals, top_idx[..., None], axis=1)
    bidx = jnp.broadcast_to(
        jnp.arange(B, dtype=jnp.float32)[:, None, None], (B, POST_NMS_TOPN, 1))
    rois = jnp.concatenate([bidx, sel], axis=-1)                     # (B, topN, 5)
    return rois, 0.0, 0.0


# ======================= ROI Align sampling indices / weights (JAX) =======================
def roi_align_indices(rois, Hf, Wf, P, spatial_scale, s):
    """Returns flat row indices (R, P*P, 4*s*s) and bilinear weights of same shape."""
    R = rois.shape[0]
    bidx = rois[:, 0].astype(jnp.int32)
    x1 = rois[:, 1] * spatial_scale
    y1 = rois[:, 2] * spatial_scale
    x2 = rois[:, 3] * spatial_scale
    y2 = rois[:, 4] * spatial_scale
    roi_w = jnp.maximum(x2 - x1, 1.0)
    roi_h = jnp.maximum(y2 - y1, 1.0)
    bin_w = roi_w / P
    bin_h = roi_h / P

    pg = jnp.arange(P, dtype=jnp.float32)
    ig = jnp.arange(s, dtype=jnp.float32)
    y = y1[:, None, None] + (pg[None, :, None] + (ig[None, None, :] + 0.5) / s) * bin_h[:, None, None]
    x = x1[:, None, None] + (pg[None, :, None] + (ig[None, None, :] + 0.5) / s) * bin_w[:, None, None]

    def interp_1d(coord, size):
        valid = (coord >= -1.0) & (coord <= float(size))
        c = jnp.clip(coord, 0.0, float(size - 1))
        lo = jnp.minimum(jnp.floor(c).astype(jnp.int32), size - 1)
        hi = jnp.minimum(lo + 1, size - 1)
        w_lo = 1.0 - (c - lo.astype(jnp.float32))
        w_hi = 1.0 - w_lo
        w_lo = jnp.where(valid, w_lo, 0.0)
        w_hi = jnp.where(valid, w_hi, 0.0)
        return lo, hi, w_lo, w_hi

    y_lo, y_hi, wy_lo, wy_hi = interp_1d(y, Hf)
    x_lo, x_hi, wx_lo, wx_hi = interp_1d(x, Wf)

    shape5 = (R, P, P, s, s)
    ey = lambda a: jnp.broadcast_to(a[:, :, None, :, None], shape5)
    ex = lambda a: jnp.broadcast_to(a[:, None, :, None, :], shape5)
    b5 = jnp.broadcast_to(bidx[:, None, None, None, None], shape5)

    ys = (ey(y_lo), ey(y_lo), ey(y_hi), ey(y_hi))
    xs = (ex(x_lo), ex(x_hi), ex(x_lo), ex(x_hi))
    ws = (ey(wy_lo) * ex(wx_lo), ey(wy_lo) * ex(wx_hi),
          ey(wy_hi) * ex(wx_lo), ey(wy_hi) * ex(wx_hi))

    idx = jnp.stack([b5 * (Hf * Wf) + yy * Wf + xx for yy, xx in zip(ys, xs)], axis=-1)
    wts = jnp.stack(ws, axis=-1) / float(s * s)
    T = 4 * s * s
    return idx.reshape(R, P * P, T), wts.reshape(R, P * P, T).astype(jnp.float32)


# ======================= full forward (inference path) =======================
def pva_faster_rcnn_forward(packed, im_data, im_info, gt_boxes):
    del gt_boxes  # only used in training
    B = im_data.shape[0]

    # NCHW -> NHWC exactly once; the whole model stays NHWC bf16 from here on.
    x = jnp.transpose(im_data, (0, 2, 3, 1)).astype(jnp.bfloat16)
    x = jnp.pad(x, ((0, 0), (0, 0), (0, 0), (0, _ceil16(IM_C) - IM_C)))

    # RCNN_base: synthetic 3-conv backbone (total stride FEAT_STRIDE).  Feature maps
    # are sliced back to their (16-rounded) real channel count before each im2col so
    # the contraction dim stays small (no 128-wide zero-math).
    x = conv2d_nhwc(x, packed["base1_w"], packed["base1_b"], 3, 3, 2, 1)
    x = conv2d_nhwc(x[..., :_ceil16(BASE1_COUT)],
                    packed["base2_w"], packed["base2_b"], 3, 3, 2, 1)
    base_feat = conv2d_nhwc(x[..., :_ceil16(BASE2_COUT)],
                            packed["base3_w"], packed["base3_b"], 3, 3, 2, 1)

    # RCNN_rpn -> rois (single fused Pallas kernel, M-tiled, + JAX proposal glue).
    rois, _, _ = rcnn_rpn(packed, base_feat, im_info)

    # ROI Align: bilinear corner gather + weighted accumulation over the 4*s*s taps in
    # XLA on compact weights (no C-broadcast slab); fc6/fc7/heads/softmax fused in one
    # Pallas kernel on the small pooled (R, P*P*C) slab.
    Bc, Hf, Wf, _ = base_feat.shape
    C = DOUT_BASE
    rois_flat = rois.reshape(-1, 5)
    R = rois_flat.shape[0]
    D = POOL * POOL * C
    idx, wts = roi_align_indices(rois_flat, Hf, Wf, POOL, 1.0 / FEAT_STRIDE,
                                 SAMPLING_RATIO)                     # (R, P*P, T)
    feat_flat = base_feat[..., :C].reshape(Bc * Hf * Wf, C)          # bf16
    # TODO(synk): the bilinear corner gather stays in XLA; a data-dependent Pallas DMA
    # gather (scalar prefetch) is overkill at these sizes.
    g = jnp.take(feat_flat, idx.reshape(-1), axis=0)
    g = g.reshape(R, POOL * POOL, -1, C).astype(jnp.float32)         # (R, P*P, T, C)
    pooled = jnp.sum(g * wts[..., None], axis=2).reshape(R, D)       # (R, D) f32

    # >=2 parallel grid steps over R where possible (v7x megacore); f32 blocks keep the
    # sublane-of-8 tiles legal.
    tm_r = R // 2 if (R >= 16 and (R // 2) % 8 == 0) else R
    out = pl.pallas_call(
        functools.partial(_rcnn_head_kernel, n_classes=N_CLASSES),
        out_shape=jax.ShapeDtypeStruct((R, CPAD), jnp.float32),
        grid=(R // tm_r,),
        in_specs=[
            pl.BlockSpec((tm_r, D), lambda i: (i, 0)),
            pl.BlockSpec((D, CPAD), lambda i: (0, 0)),
            pl.BlockSpec((1, CPAD), lambda i: (0, 0)),
            pl.BlockSpec((CPAD, CPAD), lambda i: (0, 0)),
            pl.BlockSpec((1, CPAD), lambda i: (0, 0)),
            pl.BlockSpec((CPAD, CPAD), lambda i: (0, 0)),
            pl.BlockSpec((1, CPAD), lambda i: (0, 0)),
        ],
        out_specs=pl.BlockSpec((tm_r, CPAD), lambda i: (i, 0)),
        compiler_params=pltpu.CompilerParams(dimension_semantics=("parallel",)),
    )(pooled, packed["fc6_w"], packed["fc6_b"],
      packed["fc7_w"], packed["fc7_b"], packed["head_w"], packed["head_b"])

    cls_prob = out[:, :N_CLASSES].reshape(B, POST_NMS_TOPN, N_CLASSES)
    bbox_pred = out[:, N_CLASSES:N_CLASSES + 4 * N_CLASSES].reshape(
        B, POST_NMS_TOPN, 4 * N_CLASSES)
    return rois, cls_prob, bbox_pred


# ======================= parameter init (PyTorch-style layouts) =======================
def init_params(key):
    ks = jax.random.split(key, 12)
    n = lambda k, shape, std: std * jax.random.normal(k, shape, jnp.float32)
    z = lambda c: jnp.zeros((c,), jnp.float32)
    A = NUM_ANCHORS
    return {
        # synthetic backbone
        "base1_w": n(ks[0], (BASE1_COUT, IM_C, 3, 3), 0.1),        "base1_b": z(BASE1_COUT),
        "base2_w": n(ks[1], (BASE2_COUT, BASE1_COUT, 3, 3), 0.1),  "base2_b": z(BASE2_COUT),
        "base3_w": n(ks[2], (BASE3_COUT, BASE2_COUT, 3, 3), 0.1),  "base3_b": z(BASE3_COUT),
        # RPN
        "rpn_conv_w": n(ks[3], (RPN_DIN, DOUT_BASE, 3, 3), 0.01), "rpn_conv_b": z(RPN_DIN),
        "rpn_cls_w": n(ks[4], (2 * A, RPN_DIN, 1, 1), 0.05),      "rpn_cls_b": z(2 * A),
        "rpn_bbox_w": n(ks[5], (4 * A, RPN_DIN, 1, 1), 0.05),     "rpn_bbox_b": z(4 * A),
        # RCNN_top + heads.  NOTE: fc6 input flatten order here is (P,P,C) (NHWC pooled
        # layout) instead of PyTorch's (C,P,P); weights are synthetic so only the
        # interpretation of the flatten order differs.
        "fc6_w": n(ks[6], (RCNN_DIN, DOUT_BASE * POOL * POOL), 0.01), "fc6_b": z(RCNN_DIN),
        "fc7_w": n(ks[7], (RCNN_LAST, RCNN_DIN), 0.01),               "fc7_b": z(RCNN_LAST),
        "cls_w": n(ks[8], (N_CLASSES, RCNN_LAST), 0.05),              "cls_b": z(N_CLASSES),
        "bbox_w": n(ks[9], (4 * N_CLASSES, RCNN_LAST), 0.05),         "bbox_b": z(4 * N_CLASSES),
    }


# ======================= one-time weight packing for the kernels =======================
def _pack_conv(w, b, cin_pad, cout_pad=CPAD):
    """cin padded only to the bf16 sublane multiple of 16; cout padded to 128 lanes."""
    cout, cin, kh, kw = w.shape
    wt = jnp.transpose(w, (2, 3, 1, 0))                              # (kh,kw,cin,cout)
    wt = jnp.pad(wt, ((0, 0), (0, 0), (0, cin_pad - cin), (0, cout_pad - cout)))
    wt = wt.reshape(kh * kw * cin_pad, cout_pad).astype(jnp.bfloat16)
    bb = jnp.pad(b, (0, cout_pad - cout)).reshape(1, cout_pad).astype(jnp.float32)
    return wt, bb


def _pad2(w, rows, cols):
    r, c = w.shape
    return jnp.pad(w, ((0, rows - r), (0, cols - c)))


def _pad_bias(b, n=CPAD):
    return jnp.pad(b, (0, n - b.shape[0])).reshape(1, n).astype(jnp.float32)


def prepare_params(p):
    A = NUM_ANCHORS
    packed = {}
    packed["base1_w"], packed["base1_b"] = _pack_conv(p["base1_w"], p["base1_b"],
                                                      _ceil16(IM_C))
    packed["base2_w"], packed["base2_b"] = _pack_conv(p["base2_w"], p["base2_b"],
                                                      _ceil16(BASE1_COUT))
    packed["base3_w"], packed["base3_b"] = _pack_conv(p["base3_w"], p["base3_b"],
                                                      _ceil16(BASE2_COUT))
    packed["rpn_conv_w"], packed["rpn_conv_b"] = _pack_conv(
        p["rpn_conv_w"], p["rpn_conv_b"], _ceil16(DOUT_BASE))

    # 1x1 RPN heads: fold the (bg,fg) softmax into a fg-bg weight difference
    # (softmax fg prob == sigmoid(fg - bg)) and concatenate with the bbox head.
    cls_w = p["rpn_cls_w"].reshape(2 * A, RPN_DIN)
    diff_w = cls_w[A:] - cls_w[:A]
    diff_b = p["rpn_cls_b"][A:] - p["rpn_cls_b"][:A]
    bbox_w = p["rpn_bbox_w"].reshape(4 * A, RPN_DIN)
    comb_w = jnp.concatenate([diff_w, bbox_w], axis=0).T             # (RPN_DIN, 5A)
    comb_b = jnp.concatenate([diff_b, p["rpn_bbox_b"]], axis=0)
    packed["rpn_head_w"] = _pad2(comb_w, CPAD, CPAD).astype(jnp.bfloat16)
    packed["rpn_head_b"] = _pad_bias(comb_b)

    # RCNN tail (fc6 / fc7 / concatenated cls+bbox heads), outputs padded to 128 lanes.
    packed["fc6_w"] = _pad2(p["fc6_w"].T, POOL * POOL * DOUT_BASE, CPAD).astype(jnp.bfloat16)
    packed["fc6_b"] = _pad_bias(p["fc6_b"])
    packed["fc7_w"] = _pad2(p["fc7_w"].T, CPAD, CPAD).astype(jnp.bfloat16)
    packed["fc7_b"] = _pad_bias(p["fc7_b"])
    head_w = jnp.concatenate([p["cls_w"], p["bbox_w"]], axis=0).T    # (RCNN_LAST, 20)
    head_b = jnp.concatenate([p["cls_b"], p["bbox_b"]], axis=0)
    packed["head_w"] = _pad2(head_w, CPAD, CPAD).astype(jnp.bfloat16)
    packed["head_b"] = _pad_bias(head_b)
    return packed


if __name__ == "__main__":
    key = jax.random.PRNGKey(0)
    k_param, k_im, k_gt = jax.random.split(key, 3)
    params = init_params(k_param)
    packed = prepare_params(params)

    im_data = jax.random.normal(k_im, (BATCH, IM_C, IM_H, IM_W), jnp.float32)
    im_info = jnp.tile(jnp.array([[IM_H, IM_W, 1.0]], jnp.float32), (BATCH, 1))
    gt_boxes = jax.random.uniform(k_gt, (BATCH, 5, 5), jnp.float32) * IM_H

    fwd = jax.jit(pva_faster_rcnn_forward)
    rois, cls_prob, bbox_pred = fwd(packed, im_data, im_info, gt_boxes)
    jax.block_until_ready((rois, cls_prob, bbox_pred))

    assert rois.shape == (BATCH, POST_NMS_TOPN, 5)
    assert cls_prob.shape == (BATCH, POST_NMS_TOPN, N_CLASSES)
    assert bbox_pred.shape == (BATCH, POST_NMS_TOPN, 4 * N_CLASSES)
    assert bool(jnp.all(jnp.isfinite(cls_prob))) and bool(jnp.all(jnp.isfinite(bbox_pred)))
    print("KERNEL_OK")
</pallas_src>

<mosaic_0001>
module attributes {stable_mosaic.version = 11 : i64} {
  func.func @_conv_kernel(%arg0: i32, %arg1: memref<256x144xbf16, #tpu.memory_space<vmem>>, %arg2: memref<144x128xbf16, #tpu.memory_space<vmem>>, %arg3: memref<1x128xf32, #tpu.memory_space<vmem>>, %arg4: memref<256x128xbf16, #tpu.memory_space<vmem>>) attributes {dimension_semantics = [#tpu.dimension_semantics<parallel>], iteration_bounds = array<i64: 2>, scalar_prefetch = 0 : i64, scratch_operands = 0 : i64, tpu.core_type = #tpu.core_type<tc>, window_params = [{transform_indices = @transform_0, window_bounds = array<i64: 256, 144>}, {pipeline_mode = #tpu.pipeline_mode<synchronous>, transform_indices = @transform_1, window_bounds = array<i64: 144, 128>}, {pipeline_mode = #tpu.pipeline_mode<synchronous>, transform_indices = @transform_2, window_bounds = array<i64: 1, 128>}, {transform_indices = @transform_3, window_bounds = array<i64: 256, 128>}]} {
    %c0 = arith.constant 0 : index
    %c0_0 = arith.constant 0 : index
    %0 = vector.load %arg1[%c0, %c0_0] : memref<256x144xbf16, #tpu.memory_space<vmem>>, vector<256x144xbf16>
    %c0_1 = arith.constant 0 : index
    %c0_2 = arith.constant 0 : index
    %1 = vector.load %arg2[%c0_1, %c0_2] : memref<144x128xbf16, #tpu.memory_space<vmem>>, vector<144x128xbf16>
    %cst = arith.constant dense<0.000000e+00> : vector<256x128xf32>
    %2 = tpu.matmul %0, %1, %cst {dimension_numbers = #tpu.dot_dimension_numbers<[1], [0], [0], [1], [0, 0, 1, 1], [], []>} : vector<256x144xbf16>, vector<144x128xbf16>, vector<256x128xf32> -> vector<256x128xf32>
    %c0_3 = arith.constant 0 : index
    %c0_4 = arith.constant 0 : index
    %3 = vector.load %arg3[%c0_3, %c0_4] : memref<1x128xf32, #tpu.memory_space<vmem>>, vector<1x128xf32>
    %4 = vector.broadcast %3 : vector<1x128xf32> to vector<256x128xf32>
    %5 = arith.addf %2, %4 : vector<256x128xf32>
    %cst_5 = arith.constant 0.000000e+00 : f32
    %6 = vector.broadcast %cst_5 : f32 to vector<256x128xf32>
    %7 = arith.maximumf %5, %6 : vector<256x128xf32>
    %8 = arith.truncf %7 : vector<256x128xf32> to vector<256x128xbf16>
    %c0_6 = arith.constant 0 : index
    %c0_7 = arith.constant 0 : index
    %9 = vector.load %arg4[%c0_6, %c0_7] : memref<256x128xbf16, #tpu.memory_space<vmem>>, vector<256x128xbf16>
    tpu.vector_store %arg4[%c0_6, %c0_7], %8 {strides = array<i32>} : memref<256x128xbf16, #tpu.memory_space<vmem>>, vector<256x128xbf16>,
    return
  }
  func.func @transform_0(%arg0: i32) -> (i32, i32) {
    %c0_i32 = arith.constant 0 : i32
    %c0_i32_0 = arith.constant 0 : i32
    return %arg0, %c0_i32 : i32, i32
  }
  func.func @transform_1(%arg0: i32) -> (i32, i32) {
    %c0_i32 = arith.constant 0 : i32
    %c0_i32_0 = arith.constant 0 : i32
    %c0_i32_1 = arith.constant 0 : i32
    return %c0_i32, %c0_i32_0 : i32, i32
  }
  func.func @transform_2(%arg0: i32) -> (i32, i32) {
    %c0_i32 = arith.constant 0 : i32
    %c0_i32_0 = arith.constant 0 : i32
    %c0_i32_1 = arith.constant 0 : i32
    return %c0_i32, %c0_i32_0 : i32, i32
  }
  func.func @transform_3(%arg0: i32) -> (i32, i32) {
    %c0_i32 = arith.constant 0 : i32
    %c0_i32_0 = arith.constant 0 : i32
    return %arg0, %c0_i32 : i32, i32
  }
}

module attributes {stable_mosaic.version = 11 : i64} {
  func.func @_conv_kernel(%arg0: i32, %arg1: memref<64x144xbf16, #tpu.memory_space<vmem>>, %arg2: memref<144x128xbf16, #tpu.memory_space<vmem>>, %arg3: memref<1x128xf32, #tpu.memory_space<vmem>>, %arg4: memref<64x128xbf16, #tpu.memory_space<vmem>>) attributes {dimension_semantics = [#tpu.dimension_semantics<parallel>], iteration_bounds = array<i64: 2>, scalar_prefetch = 0 : i64, scratch_operands = 0 : i64, tpu.core_type = #tpu.core_type<tc>, window_params = [{transform_indices = @transform_0, window_bounds = array<i64: 64, 144>}, {pipeline_mode = #tpu.pipeline_mode<synchronous>, transform_indices = @transform_1, window_bounds = array<i64: 144, 128>}, {pipeline_mode = #tpu.pipeline_mode<synchronous>, transform_indices = @transform_2, window_bounds = array<i64: 1, 128>}, {transform_indices = @transform_3, window_bounds = array<i64: 64, 128>}]} {
    %c0 = arith.constant 0 : index
    %c0_0 = arith.constant 0 : index
    %0 = vector.load %arg1[%c0, %c0_0] : memref<64x144xbf16, #tpu.memory_space<vmem>>, vector<64x144xbf16>
    %c0_1 = arith.constant 0 : index
    %c0_2 = arith.constant 0 : index
    %1 = vector.load %arg2[%c0_1, %c0_2] : memref<144x128xbf16, #tpu.memory_space<vmem>>, vector<144x128xbf16>
    %cst = arith.constant dense<0.000000e+00> : vector<64x128xf32>
    %2 = tpu.matmul %0, %1, %cst {dimension_numbers = #tpu.dot_dimension_numbers<[1], [0], [0], [1], [0, 0, 1, 1], [], []>} : vector<64x144xbf16>, vector<144x128xbf16>, vector<64x128xf32> -> vector<64x128xf32>
    %c0_3 = arith.constant 0 : index
    %c0_4 = arith.constant 0 : index
    %3 = vector.load %arg3[%c0_3, %c0_4] : memref<1x128xf32, #tpu.memory_space<vmem>>, vector<1x128xf32>
    %4 = vector.broadcast %3 : vector<1x128xf32> to vector<64x128xf32>
    %5 = arith.addf %2, %4 : vector<64x128xf32>
    %cst_5 = arith.constant 0.000000e+00 : f32
    %6 = vector.broadcast %cst_5 : f32 to vector<64x128xf32>
    %7 = arith.maximumf %5, %6 : vector<64x128xf32>
    %8 = arith.truncf %7 : vector<64x128xf32> to vector<64x128xbf16>
    %c0_6 = arith.constant 0 : index
    %c0_7 = arith.constant 0 : index
    %9 = vector.load %arg4[%c0_6, %c0_7] : memref<64x128xbf16, #tpu.memory_space<vmem>>, vector<64x128xbf16>
    tpu.vector_store %arg4[%c0_6, %c0_7], %8 {strides = array<i32>} : memref<64x128xbf16, #tpu.memory_space<vmem>>, vector<64x128xbf16>,
    return
  }
  func.func @transform_0(%arg0: i32) -> (i32, i32) {
    %c0_i32 = arith.constant 0 : i32
    %c0_i32_0 = arith.constant 0 : i32
    return %arg0, %c0_i32 : i32, i32
  }
  func.func @transform_1(%arg0: i32) -> (i32, i32) {
    %c0_i32 = arith.constant 0 : i32
    %c0_i32_0 = arith.constant 0 : i32
    %c0_i32_1 = arith.constant 0 : i32
    return %c0_i32, %c0_i32_0 : i32, i32
  }
  func.func @transform_2(%arg0: i32) -> (i32, i32) {
    %c0_i32 = arith.constant 0 : i32
    %c0_i32_0 = arith.constant 0 : i32
    %c0_i32_1 = arith.constant 0 : i32
    return %c0_i32, %c0_i32_0 : i32, i32
  }
  func.func @transform_3(%arg0: i32) -> (i32, i32) {
    %c0_i32 = arith.constant 0 : i32
    %c0_i32_0 = arith.constant 0 : i32
    return %arg0, %c0_i32 : i32, i32
  }
}

module attributes {stable_mosaic.version = 11 : i64} {
  func.func @_conv_kernel(%arg0: i32, %arg1: memref<16x288xbf16, #tpu.memory_space<vmem>>, %arg2: memref<288x128xbf16, #tpu.memory_space<vmem>>, %arg3: memref<1x128xf32, #tpu.memory_space<vmem>>, %arg4: memref<16x128xbf16, #tpu.memory_space<vmem>>) attributes {dimension_semantics = [#tpu.dimension_semantics<parallel>], iteration_bounds = array<i64: 2>, scalar_prefetch = 0 : i64, scratch_operands = 0 : i64, tpu.core_type = #tpu.core_type<tc>, window_params = [{transform_indices = @transform_0, window_bounds = array<i64: 16, 288>}, {pipeline_mode = #tpu.pipeline_mode<synchronous>, transform_indices = @transform_1, window_bounds = array<i64: 288, 128>}, {pipeline_mode = #tpu.pipeline_mode<synchronous>, transform_indices = @transform_2, window_bounds = array<i64: 1, 128>}, {transform_indices = @transform_3, window_bounds = array<i64: 16, 128>}]} {
    %c0 = arith.constant 0 : index
    %c0_0 = arith.constant 0 : index
    %0 = vector.load %arg1[%c0, %c0_0] : memref<16x288xbf16, #tpu.memory_space<vmem>>, vector<16x288xbf16>
    %c0_1 = arith.constant 0 : index
    %c0_2 = arith.constant 0 : index
    %1 = vector.load %arg2[%c0_1, %c0_2] : memref<288x128xbf16, #tpu.memory_space<vmem>>, vector<288x128xbf16>
    %cst = arith.constant dense<0.000000e+00> : vector<16x128xf32>
    %2 = tpu.matmul %0, %1, %cst {dimension_numbers = #tpu.dot_dimension_numbers<[1], [0], [0], [1], [0, 0, 1, 1], [], []>} : vector<16x288xbf16>, vector<288x128xbf16>, vector<16x128xf32> -> vector<16x128xf32>
    %c0_3 = arith.constant 0 : index
    %c0_4 = arith.constant 0 : index
    %3 = vector.load %arg3[%c0_3, %c0_4] : memref<1x128xf32, #tpu.memory_space<vmem>>, vector<1x128xf32>
    %4 = vector.broadcast %3 : vector<1x128xf32> to vector<16x128xf32>
    %5 = arith.addf %2, %4 : vector<16x128xf32>
    %cst_5 = arith.constant 0.000000e+00 : f32
    %6 = vector.broadcast %cst_5 : f32 to vector<16x128xf32>
    %7 = arith.maximumf %5, %6 : vector<16x128xf32>
    %8 = arith.truncf %7 : vector<16x128xf32> to vector<16x128xbf16>
    %c0_6 = arith.constant 0 : index
    %c0_7 = arith.constant 0 : index
    %9 = vector.load %arg4[%c0_6, %c0_7] : memref<16x128xbf16, #tpu.memory_space<vmem>>, vector<16x128xbf16>
    tpu.vector_store %arg4[%c0_6, %c0_7], %8 {strides = array<i32>} : memref<16x128xbf16, #tpu.memory_space<vmem>>, vector<16x128xbf16>,
    return
  }
  func.func @transform_0(%arg0: i32) -> (i32, i32) {
    %c0_i32 = arith.constant 0 : i32
    %c0_i32_0 = arith.constant 0 : i32
    return %arg0, %c0_i32 : i32, i32
  }
  func.func @transform_1(%arg0: i32) -> (i32, i32) {
    %c0_i32 = arith.constant 0 : i32
    %c0_i32_0 = arith.constant 0 : i32
    %c0_i32_1 = arith.constant 0 : i32
    return %c0_i32, %c0_i32_0 : i32, i32
  }
  func.func @transform_2(%arg0: i32) -> (i32, i32) {
    %c0_i32 = arith.constant 0 : i32
    %c0_i32_0 = arith.constant 0 : i32
    %c0_i32_1 = arith.constant 0 : i32
    return %c0_i32, %c0_i32_0 : i32, i32
  }
  func.func @transform_3(%arg0: i32) -> (i32, i32) {
    %c0_i32 = arith.constant 0 : i32
    %c0_i32_0 = arith.constant 0 : i32
    return %arg0, %c0_i32 : i32, i32
  }
}

module attributes {stable_mosaic.version = 11 : i64} {
  func.func @_rpn_kernel(%arg0: i32, %arg1: memref<16x288xbf16, #tpu.memory_space<vmem>>, %arg2: memref<288x128xbf16, #tpu.memory_space<vmem>>, %arg3: memref<1x128xf32, #tpu.memory_space<vmem>>, %arg4: memref<128x128xbf16, #tpu.memory_space<vmem>>, %arg5: memref<1x128xf32, #tpu.memory_space<vmem>>, %arg6: memref<16x128xf32, #tpu.memory_space<vmem>>) attributes {dimension_semantics = [#tpu.dimension_semantics<parallel>], iteration_bounds = array<i64: 2>, scalar_prefetch = 0 : i64, scratch_operands = 0 : i64, tpu.core_type = #tpu.core_type<tc>, window_params = [{transform_indices = @transform_0, window_bounds = array<i64: 16, 288>}, {pipeline_mode = #tpu.pipeline_mode<synchronous>, transform_indices = @transform_1, window_bounds = array<i64: 288, 128>}, {pipeline_mode = #tpu.pipeline_mode<synchronous>, transform_indices = @transform_2, window_bounds = array<i64: 1, 128>}, {pipeline_mode = #tpu.pipeline_mode<synchronous>, transform_indices = @transform_3, window_bounds = array<i64: 128, 128>}, {pipeline_mode = #tpu.pipeline_mode<synchronous>, transform_indices = @transform_4, window_bounds = array<i64: 1, 128>}, {transform_indices = @transform_5, window_bounds = array<i64: 16, 128>}]} {
    %c0 = arith.constant 0 : index
    %c0_0 = arith.constant 0 : index
    %0 = vector.load %arg1[%c0, %c0_0] : memref<16x288xbf16, #tpu.memory_space<vmem>>, vector<16x288xbf16>
    %c0_1 = arith.constant 0 : index
    %c0_2 = arith.constant 0 : index
    %1 = vector.load %arg2[%c0_1, %c0_2] : memref<288x128xbf16, #tpu.memory_space<vmem>>, vector<288x128xbf16>
    %cst = arith.constant dense<0.000000e+00> : vector<16x128xf32>
    %2 = tpu.matmul %0, %1, %cst {dimension_numbers = #tpu.dot_dimension_numbers<[1], [0], [0], [1], [0, 0, 1, 1], [], []>} : vector<16x288xbf16>, vector<288x128xbf16>, vector<16x128xf32> -> vector<16x128xf32>
    %c0_3 = arith.constant 0 : index
    %c0_4 = arith.constant 0 : index
    %3 = vector.load %arg3[%c0_3, %c0_4] : memref<1x128xf32, #tpu.memory_space<vmem>>, vector<1x128xf32>
    %4 = vector.broadcast %3 : vector<1x128xf32> to vector<16x128xf32>
    %5 = arith.addf %2, %4 : vector<16x128xf32>
    %cst_5 = arith.constant 0.000000e+00 : f32
    %6 = vector.broadcast %cst_5 : f32 to vector<16x128xf32>
    %7 = arith.maximumf %5, %6 : vector<16x128xf32>
    %8 = arith.truncf %7 : vector<16x128xf32> to vector<16x128xbf16>
    %c0_6 = arith.constant 0 : index
    %c0_7 = arith.constant 0 : index
    %9 = vector.load %arg4[%c0_6, %c0_7] : memref<128x128xbf16, #tpu.memory_space<vmem>>, vector<128x128xbf16>
    %cst_8 = arith.constant dense<0.000000e+00> : vector<16x128xf32>
    %10 = tpu.matmul %8, %9, %cst_8 {dimension_numbers = #tpu.dot_dimension_numbers<[1], [0], [0], [1], [0, 0, 1, 1], [], []>} : vector<16x128xbf16>, vector<128x128xbf16>, vector<16x128xf32> -> vector<16x128xf32>
    %c0_9 = arith.constant 0 : index
    %c0_10 = arith.constant 0 : index
    %11 = vector.load %arg5[%c0_9, %c0_10] : memref<1x128xf32, #tpu.memory_space<vmem>>, vector<1x128xf32>
    %12 = vector.broadcast %11 : vector<1x128xf32> to vector<16x128xf32>
    %13 = arith.addf %10, %12 : vector<16x128xf32>
    %14 = tpu.iota {dimensions = array<i32: 1>} : vector<16x128xi32>
    %cst_11 = arith.constant 0.000000e+00 : f32
    %15 = vector.broadcast %cst_11 : f32 to vector<16x128xf32>
    %16 = arith.subf %15, %13 : vector<16x128xf32>
    %17 = math.exp %16 : vector<16x128xf32>
    %cst_12 = arith.constant 1.000000e+00 : f32
    %18 = vector.broadcast %cst_12 : f32 to vector<16x128xf32>
    %19 = arith.addf %18, %17 : vector<16x128xf32>
    %cst_13 = arith.constant 1.000000e+00 : f32
    %20 = vector.broadcast %cst_13 : f32 to vector<16x128xf32>
    %21 = arith.divf %20, %19 : vector<16x128xf32>
    %c3_i32 = arith.constant 3 : i32
    %22 = vector.broadcast %c3_i32 : i32 to vector<16x128xi32>
    %23 = arith.cmpi slt, %14, %22 : vector<16x128xi32>
    %24 = arith.select %23, %21, %13 : vector<16x128xi1>, vector<16x128xf32>
    %c0_14 = arith.constant 0 : index
    %c0_15 = arith.constant 0 : index
    %25 = vector.load %arg6[%c0_14, %c0_15] : memref<16x128xf32, #tpu.memory_space<vmem>>, vector<16x128xf32>
    tpu.vector_store %arg6[%c0_14, %c0_15], %24 {strides = array<i32>} : memref<16x128xf32, #tpu.memory_space<vmem>>, vector<16x128xf32>,
    return
  }
  func.func @transform_0(%arg0: i32) -> (i32, i32) {
    %c0_i32 = arith.constant 0 : i32
    %c0_i32_0 = arith.constant 0 : i32
    return %arg0, %c0_i32 : i32, i32
  }
  func.func @transform_1(%arg0: i32) -> (i32, i32) {
    %c0_i32 = arith.constant 0 : i32
    %c0_i32_0 = arith.constant 0 : i32
    %c0_i32_1 = arith.constant 0 : i32
    return %c0_i32, %c0_i32_0 : i32, i32
  }
  func.func @transform_2(%arg0: i32) -> (i32, i32) {
    %c0_i32 = arith.constant 0 : i32
    %c0_i32_0 = arith.constant 0 : i32
    %c0_i32_1 = arith.constant 0 : i32
    return %c0_i32, %c0_i32_0 : i32, i32
  }
  func.func @transform_3(%arg0: i32) -> (i32, i32) {
    %c0_i32 = arith.constant 0 : i32
    %c0_i32_0 = arith.constant 0 : i32
    %c0_i32_1 = arith.constant 0 : i32
    return %c0_i32, %c0_i32_0 : i32, i32
  }
  func.func @transform_4(%arg0: i32) -> (i32, i32) {
    %c0_i32 = arith.constant 0 : i32
    %c0_i32_0 = arith.constant 0 : i32
    %c0_i32_1 = arith.constant 0 : i32
    return %c0_i32, %c0_i32_0 : i32, i32
  }
  func.func @transform_5(%arg0: i32) -> (i32, i32) {
    %c0_i32 = arith.constant 0 : i32
    %c0_i32_0 = arith.constant 0 : i32
    return %arg0, %c0_i32 : i32, i32
  }
}

module attributes {stable_mosaic.version = 11 : i64} {
  func.func @_rcnn_head_kernel(%arg0: i32, %arg1: memref<8x512xf32, #tpu.memory_space<vmem>>, %arg2: memref<512x128xbf16, #tpu.memory_space<vmem>>, %arg3: memref<1x128xf32, #tpu.memory_space<vmem>>, %arg4: memref<128x128xbf16, #tpu.memory_space<vmem>>, %arg5: memref<1x128xf32, #tpu.memory_space<vmem>>, %arg6: memref<128x128xbf16, #tpu.memory_space<vmem>>, %arg7: memref<1x128xf32, #tpu.memory_space<vmem>>, %arg8: memref<8x128xf32, #tpu.memory_space<vmem>>) attributes {dimension_semantics = [#tpu.dimension_semantics<parallel>], iteration_bounds = array<i64: 2>, scalar_prefetch = 0 : i64, scratch_operands = 0 : i64, tpu.core_type = #tpu.core_type<tc>, window_params = [{transform_indices = @transform_0, window_bounds = array<i64: 8, 512>}, {pipeline_mode = #tpu.pipeline_mode<synchronous>, transform_indices = @transform_1, window_bounds = array<i64: 512, 128>}, {pipeline_mode = #tpu.pipeline_mode<synchronous>, transform_indices = @transform_2, window_bounds = array<i64: 1, 128>}, {pipeline_mode = #tpu.pipeline_mode<synchronous>, transform_indices = @transform_3, window_bounds = array<i64: 128, 128>}, {pipeline_mode = #tpu.pipeline_mode<synchronous>, transform_indices = @transform_4, window_bounds = array<i64: 1, 128>}, {pipeline_mode = #tpu.pipeline_mode<synchronous>, transform_indices = @transform_5, window_bounds = array<i64: 128, 128>}, {pipeline_mode = #tpu.pipeline_mode<synchronous>, transform_indices = @transform_6, window_bounds = array<i64: 1, 128>}, {transform_indices = @transform_7, window_bounds = array<i64: 8, 128>}]} {
    %c0 = arith.constant 0 : index
    %c0_0 = arith.constant 0 : index
    %0 = vector.load %arg1[%c0, %c0_0] : memref<8x512xf32, #tpu.memory_space<vmem>>, vector<8x512xf32>
    %1 = arith.truncf %0 : vector<8x512xf32> to vector<8x512xbf16>
    %c0_1 = arith.constant 0 : index
    %c0_2 = arith.constant 0 : index
    %2 = vector.load %arg2[%c0_1, %c0_2] : memref<512x128xbf16, #tpu.memory_space<vmem>>, vector<512x128xbf16>
    %cst = arith.constant dense<0.000000e+00> : vector<8x128xf32>
    %3 = tpu.matmul %1, %2, %cst {dimension_numbers = #tpu.dot_dimension_numbers<[1], [0], [0], [1], [0, 0, 1, 1], [], []>} : vector<8x512xbf16>, vector<512x128xbf16>, vector<8x128xf32> -> vector<8x128xf32>
    %c0_3 = arith.constant 0 : index
    %c0_4 = arith.constant 0 : index
    %4 = vector.load %arg3[%c0_3, %c0_4] : memref<1x128xf32, #tpu.memory_space<vmem>>, vector<1x128xf32>
    %5 = vector.broadcast %4 : vector<1x128xf32> to vector<8x128xf32>
    %6 = arith.addf %3, %5 : vector<8x128xf32>
    %cst_5 = arith.constant 0.000000e+00 : f32
    %7 = vector.broadcast %cst_5 : f32 to vector<8x128xf32>
    %8 = arith.maximumf %6, %7 : vector<8x128xf32>
    %9 = arith.truncf %8 : vector<8x128xf32> to vector<8x128xbf16>
    %c0_6 = arith.constant 0 : index
    %c0_7 = arith.constant 0 : index
    %10 = vector.load %arg4[%c0_6, %c0_7] : memref<128x128xbf16, #tpu.memory_space<vmem>>, vector<128x128xbf16>
    %cst_8 = arith.constant dense<0.000000e+00> : vector<8x128xf32>
    %11 = tpu.matmul %9, %10, %cst_8 {dimension_numbers = #tpu.dot_dimension_numbers<[1], [0], [0], [1], [0, 0, 1, 1], [], []>} : vector<8x128xbf16>, vector<128x128xbf16>, vector<8x128xf32> -> vector<8x128xf32>
    %c0_9 = arith.constant 0 : index
    %c0_10 = arith.constant 0 : index
    %12 = vector.load %arg5[%c0_9, %c0_10] : memref<1x128xf32, #tpu.memory_space<vmem>>, vector<1x128xf32>
    %13 = vector.broadcast %12 : vector<1x128xf32> to vector<8x128xf32>
    %14 = arith.addf %11, %13 : vector<8x128xf32>
    %cst_11 = arith.constant 0.000000e+00 : f32
    %15 = vector.broadcast %cst_11 : f32 to vector<8x128xf32>
    %16 = arith.maximumf %14, %15 : vector<8x128xf32>
    %17 = arith.truncf %16 : vector<8x128xf32> to vector<8x128xbf16>
    %c0_12 = arith.constant 0 : index
    %c0_13 = arith.constant 0 : index
    %18 = vector.load %arg6[%c0_12, %c0_13] : memref<128x128xbf16, #tpu.memory_space<vmem>>, vector<128x128xbf16>
    %cst_14 = arith.constant dense<0.000000e+00> : vector<8x128xf32>
    %19 = tpu.matmul %17, %18, %cst_14 {dimension_numbers = #tpu.dot_dimension_numbers<[1], [0], [0], [1], [0, 0, 1, 1], [], []>} : vector<8x128xbf16>, vector<128x128xbf16>, vector<8x128xf32> -> vector<8x128xf32>
    %c0_15 = arith.constant 0 : index
    %c0_16 = arith.constant 0 : index
    %20 = vector.load %arg7[%c0_15, %c0_16] : memref<1x128xf32, #tpu.memory_space<vmem>>, vector<1x128xf32>
    %21 = vector.broadcast %20 : vector<1x128xf32> to vector<8x128xf32>
    %22 = arith.addf %19, %21 : vector<8x128xf32>
    %23 = tpu.iota {dimensions = array<i32: 1>} : vector<8x128xi32>
    %c4_i32 = arith.constant 4 : i32
    %24 = vector.broadcast %c4_i32 : i32 to vector<8x128xi32>
    %25 = arith.cmpi slt, %23, %24 : vector<8x128xi32>
    %cst_17 = arith.constant -1.000000e+30 : f32
    %26 = vector.broadcast %cst_17 : f32 to vector<8x128xf32>
    %27 = arith.select %25, %22, %26 : vector<8x128xi1>, vector<8x128xf32>
    %cst_18 = arith.constant dense<0xFF800000> : vector<8xf32>
    %28 = vector.multi_reduction <maximumf>, %27, %cst_18 [1] : vector<8x128xf32> to vector<8xf32>
    %29 = vector.shape_cast %28 : vector<8xf32> to vector<8x1xf32>
    %30 = vector.broadcast %29 : vector<8x1xf32> to vector<8x128xf32>
    %31 = arith.subf %27, %30 : vector<8x128xf32>
    %32 = math.exp %31 : vector<8x128xf32>
    %cst_19 = arith.constant dense<0.000000e+00> : vector<8xf32>
    %33 = vector.multi_reduction <add>, %32, %cst_19 [1] : vector<8x128xf32> to vector<8xf32>
    %34 = vector.shape_cast %33 : vector<8xf32> to vector<8x1xf32>
    %35 = vector.broadcast %34 : vector<8x1xf32> to vector<8x128xf32>
    %36 = arith.divf %32, %35 : vector<8x128xf32>
    %37 = arith.select %25, %36, %22 : vector<8x128xi1>, vector<8x128xf32>
    %c0_20 = arith.constant 0 : index
    %c0_21 = arith.constant 0 : index
    %38 = vector.load %arg8[%c0_20, %c0_21] : memref<8x128xf32, #tpu.memory_space<vmem>>, vector<8x128xf32>
    tpu.vector_store %arg8[%c0_20, %c0_21], %37 {strides = array<i32>} : memref<8x128xf32, #tpu.memory_space<vmem>>, vector<8x128xf32>,
    return
  }
  func.func @transform_0(%arg0: i32) -> (i32, i32) {
    %c0_i32 = arith.constant 0 : i32
    %c0_i32_0 = arith.constant 0 : i32
    return %arg0, %c0_i32 : i32, i32
  }
  func.func @transform_1(%arg0: i32) -> (i32, i32) {
    %c0_i32 = arith.constant 0 : i32
    %c0_i32_0 = arith.constant 0 : i32
    %c0_i32_1 = arith.constant 0 : i32
    return %c0_i32, %c0_i32_0 : i32, i32
  }
  func.func @transform_2(%arg0: i32) -> (i32, i32) {
    %c0_i32 = arith.constant 0 : i32
    %c0_i32_0 = arith.constant 0 : i32
    %c0_i32_1 = arith.constant 0 : i32
    return %c0_i32, %c0_i32_0 : i32, i32
  }
  func.func @transform_3(%arg0: i32) -> (i32, i32) {
    %c0_i32 = arith.constant 0 : i32
    %c0_i32_0 = arith.constant 0 : i32
    %c0_i32_1 = arith.constant 0 : i32
    return %c0_i32, %c0_i32_0 : i32, i32
  }
  func.func @transform_4(%arg0: i32) -> (i32, i32) {
    %c0_i32 = arith.constant 0 : i32
    %c0_i32_0 = arith.constant 0 : i32
    %c0_i32_1 = arith.constant 0 : i32
    return %c0_i32, %c0_i32_0 : i32, i32
  }
  func.func @transform_5(%arg0: i32) -> (i32, i32) {
    %c0_i32 = arith.constant 0 : i32
    %c0_i32_0 = arith.constant 0 : i32
    %c0_i32_1 = arith.constant 0 : i32
    return %c0_i32, %c0_i32_0 : i32, i32
  }
  func.func @transform_6(%arg0: i32) -> (i32, i32) {
    %c0_i32 = arith.constant 0 : i32
    %c0_i32_0 = arith.constant 0 : i32
    %c0_i32_1 = arith.constant 0 : i32
    return %c0_i32, %c0_i32_0 : i32, i32
  }
  func.func @transform_7(%arg0: i32) -> (i32, i32) {
    %c0_i32 = arith.constant 0 : i32
    %c0_i32_0 = arith.constant 0 : i32
    return %arg0, %c0_i32 : i32, i32
  }
}

</mosaic_0001>

<bundles_post_ra>
// kernel: pva_faster_rcnn_forward.5
= control target key start
LH: loop header
LB: loop body
LE: loop exit
PB: predicated region body
PF: predicated region fallthrough
CT: control target
= control target key end

     0   :  { %s1234_s12 = smov 0   ;;  %s1387_s0 = inlined_call_operand.vmem [shape: bf16[512,144], index: 0, kind: input, shape index: {}]   ;;  %s1388_s1 = inlined_call_operand.vmem [shape: bf16[144,128], index: 1, kind: input, shape index: {}]   ;;  %s1389_s2 = inlined_call_operand.vmem [shape: f32[1,128], index: 2, kind: input, shape index: {}]   ;;  %s1390_s3 = inlined_call_operand.vmem [shape: bf16[512,128], index: 3, kind: output, shape index: {}]  }
   0x1 LB: > { %s891_s13 = sadd.s32 4294967295, %s1211_s12   ;;  %p895_p0 = scmp.ge.s32.totalorder %s1211_s12, 1  ;;  %s1211_s12 = sphi %s1234_s12, %s13_s12  }
   0x2   : > { %p139_p1 = scmp.lt.s32.totalorder %s1211_s12, 3 }
   0x4   : > { %p140_p2 = pnand %p895_p0, %p139_p1 }
   0x5   : > { %v1148_v0 = vld [vmem:[%s1388_s1] sm:$0xff] (!%p140_p2)   ;;  %v1213_v1 = vmov (!%p140_p2), 0   ;;  %s896_s16 = sshll.u32 (!%p140_p2), %s891_s13, 5  ;;  %v1149_v2 = vld [vmem:[%s1388_s1 + $0x8] sm:$0xff] (!%p140_p2)   ;;  %v1150_v3 = vld [vmem:[%s1388_s1 + $0x10] sm:$0xff] (!%p140_p2)   ;;  %vm433_vm0 = vcmask (!%p140_p2), 130048  }
   0x6   : > { %143 = sbr.rel (%p140_p2) target bundleno = 319 (0x13f), region = 32  ;;  %482 = vmatprep.subr.bf16.mxu0 (!%p140_p2), %v1213_v1  ;;  %1121 = vmatprep.subr.bf16.mxu1 (!%p140_p2), %v1213_v1  ;;  %p165_p3 = scmp.lt.s32.totalorder (!%p140_p2), %s896_s16, 63  ;;  %v1151_v4 = vld [vmem:[%s1388_s1 + $0x18] sm:$0xff] (!%p140_p2)   ;;  %v1152_v7 = vld [vmem:[%s1388_s1 + $0x20] sm:$0xff] (!%p140_p2)   ;;  %v1153_v8 = vld [vmem:[%s1388_s1 + $0x28] sm:$0xff] (!%p140_p2)  }
   0x7   : > { %483 = vmatpush1.bf16.msra.mxu0 (!%p140_p2), %v1148_v0  ;;  %1130 = vmatpush1.bf16.msra.mxu1 (!%p140_p2), %v1148_v0  ;;  %v1154_v9 = vld [vmem:[%s1388_s1 + $0x30] sm:$0xff] (!%p140_p2)   ;;  %v1155_v10 = vld [vmem:[%s1388_s1 + $0x38] sm:$0xff] (!%p140_p2)   ;;  %v1156_v11 = vld [vmem:[%s1388_s1 + $0x40] sm:$0xff] (!%p140_p2)  }
   0x8   : > { %484 = vmatprep.subr.bf16.mxu0 (!%p140_p2), %v1213_v1  ;;  %1122 = vmatprep.subr.bf16.mxu1 (!%p140_p2), %v1213_v1  ;;  %v1328_v42 = vld [vmem:[%s1389_s2] ss:$0 sm:$0xff] (!%p140_p2) }
   0xb   : > { %485 = vmatpush1.bf16.msra.mxu0 (!%p140_p2), %v1149_v2  ;;  %1131 = vmatpush1.bf16.msra.mxu1 (!%p140_p2), %v1149_v2 }
   0xc   : > { %486 = vmatprep.subr.bf16.mxu0 (!%p140_p2), %v1213_v1  ;;  %1123 = vmatprep.subr.bf16.mxu1 (!%p140_p2), %v1213_v1 }
   0xd   : > { %s1392_s16 = smov (!%p165_p3, %s896_s16), 63 }
   0xe   : > { %s993_s21 = sshll.u32 %s1392_s16, 3  ;;  %s900_s13 = sshll.u32 %s1392_s16, 2 }
   0xf   : > { %s1257_s24 = scalar_lea.vmem %s1387_s0, %s993_s21  ;;  %487 = vmatpush1.bf16.msra.mxu0 %v1150_v3  ;;  %1132 = vmatpush1.bf16.msra.mxu1 %v1150_v3  ;;  %s1338_s17 = scalar_lea.vmem %s1390_s3, %s900_s13 }
  0x10   : > { %v1159_v5 = vld [vmem:[%s1257_s24 + $0x4] ss:$8 sps:$4 sm:$0xff]   ;;  %488 = vmatprep.subr.bf16.mxu0 %v1213_v1  ;;  %1124 = vmatprep.subr.bf16.mxu1 %v1213_v1  ;;  %v1157_v12 = vld [vmem:[%s1257_s24] ss:$8 sps:$4 sm:$0xff]   ;;  %v1163_v14 = vld [vmem:[%s1257_s24 + $0x14] ss:$8 sps:$4 sm:$0xff]  }
  0x11   : > { %v1162_v6 = vld [vmem:[%s1257_s24 + $0x84] ss:$8 sps:$4 sm:$0xff]   ;;  %943 = vmatprep.mubr.msk.bf16.mxu0 %vm433_vm0, %v1159_v5  ;;  %v1160_v13 = vld [vmem:[%s1257_s24 + $0x80] ss:$8 sps:$4 sm:$0xff]   ;;  %v1165_v15 = vld [vmem:[%s1257_s24 + $0x94] ss:$8 sps:$4 sm:$0xff]  }
  0x12   : > { %951 = vmatprep.mubr.msk.bf16.mxu1 %vm433_vm0, %v1162_v6  ;;  %v1167_v16 = vld [vmem:[%s1257_s24 + $0x10] ss:$8 sps:$4 sm:$0xff]   ;;  %v1169_v18 = vld [vmem:[%s1257_s24 + $0x24] ss:$8 sps:$4 sm:$0xff]   ;;  %v1173_v20 = vld [vmem:[%s1257_s24 + $0x20] ss:$8 sps:$4 sm:$0xff]  }
  0x13   : > { %489 = vmatpush1.bf16.msra.mxu0 %v1151_v4  ;;  %1133 = vmatpush1.bf16.msra.mxu1 %v1151_v4  ;;  %v1168_v17 = vld [vmem:[%s1257_s24 + $0x90] ss:$8 sps:$4 sm:$0xff]   ;;  %v1171_v19 = vld [vmem:[%s1257_s24 + $0xa4] ss:$8 sps:$4 sm:$0xff]   ;;  %v1174_v21 = vld [vmem:[%s1257_s24 + $0xa0] ss:$8 sps:$4 sm:$0xff]  }
  0x14   : > { %490 = vmatprep.subr.bf16.mxu0 %v1213_v1  ;;  %1125 = vmatprep.subr.bf16.mxu1 %v1213_v1  ;;  %v1175_v22 = vld [vmem:[%s1257_s24 + $0x34] ss:$8 sps:$4 sm:$0xff]   ;;  %v1179_v24 = vld [vmem:[%s1257_s24 + $0x30] ss:$8 sps:$4 sm:$0xff]   ;;  %v1181_v26 = vld [vmem:[%s1257_s24 + $0x44] ss:$8 sps:$4 sm:$0xff]  }
  0x15   : > { %v1177_v23 = vld [vmem:[%s1257_s24 + $0xb4] ss:$8 sps:$4 sm:$0xff]   ;;  %v1180_v25 = vld [vmem:[%s1257_s24 + $0xb0] ss:$8 sps:$4 sm:$0xff]   ;;  %v1183_v27 = vld [vmem:[%s1257_s24 + $0xc4] ss:$8 sps:$4 sm:$0xff]  }
  0x16   : > { %v1185_v28 = vld [vmem:[%s1257_s24 + $0x40] ss:$8 sps:$4 sm:$0xff]   ;;  %v1187_v30 = vld [vmem:[%s1257_s24 + $0x54] ss:$8 sps:$4 sm:$0xff]   ;;  %v1191_v32 = vld [vmem:[%s1257_s24 + $0x50] ss:$8 sps:$4 sm:$0xff]  }
  0x17   : > { %491 = vmatpush1.bf16.msra.mxu0 %v1152_v7  ;;  %1134 = vmatpush1.bf16.msra.mxu1 %v1152_v7  ;;  %v1186_v29 = vld [vmem:[%s1257_s24 + $0xc0] ss:$8 sps:$4 sm:$0xff]   ;;  %v1189_v31 = vld [vmem:[%s1257_s24 + $0xd4] ss:$8 sps:$4 sm:$0xff]   ;;  %v1192_v33 = vld [vmem:[%s1257_s24 + $0xd0] ss:$8 sps:$4 sm:$0xff]  }
  0x18   : > { %492 = vmatprep.subr.bf16.mxu0 %v1213_v1  ;;  %1126 = vmatprep.subr.bf16.mxu1 %v1213_v1  ;;  %v1193_v34 = vld [vmem:[%s1257_s24 + $0x64] ss:$8 sps:$4 sm:$0xff]   ;;  %v1197_v36 = vld [vmem:[%s1257_s24 + $0x60] ss:$8 sps:$4 sm:$0xff]   ;;  %v1199_v38 = vld [vmem:[%s1257_s24 + $0x74] ss:$8 sps:$4 sm:$0xff]  }
  0x19   : > { %v1195_v35 = vld [vmem:[%s1257_s24 + $0xe4] ss:$8 sps:$4 sm:$0xff]   ;;  %v1198_v37 = vld [vmem:[%s1257_s24 + $0xe0] ss:$8 sps:$4 sm:$0xff]   ;;  %v1201_v39 = vld [vmem:[%s1257_s24 + $0xf4] ss:$8 sps:$4 sm:$0xff]  }
  0x1a   : > { %v1203_v40 = vld [vmem:[%s1257_s24 + $0x70] ss:$8 sps:$4 sm:$0xff]  }
  0x1b   : > { %493 = vmatpush1.bf16.msra.mxu0 %v1153_v8  ;;  %1135 = vmatpush1.bf16.msra.mxu1 %v1153_v8  ;;  %v1204_v41 = vld [vmem:[%s1257_s24 + $0xf0] ss:$8 sps:$4 sm:$0xff]  }
  0x1c   : > { %494 = vmatprep.subr.bf16.mxu0 %v1213_v1  ;;  %1127 = vmatprep.subr.bf16.mxu1 %v1213_v1 }
  0x1f   : > { %495 = vmatpush1.bf16.msra.mxu0 %v1154_v9  ;;  %1136 = vmatpush1.bf16.msra.mxu1 %v1154_v9 }
  0x20   : > { %496 = vmatprep.subr.bf16.mxu0 %v1213_v1  ;;  %1128 = vmatprep.subr.bf16.mxu1 %v1213_v1 }
  0x23   : > { %497 = vmatpush1.bf16.msra.mxu0 %v1155_v10  ;;  %1137 = vmatpush1.bf16.msra.mxu1 %v1155_v10 }
  0x24   : > { %498 = vmatprep.subr.bf16.mxu0 %v1213_v1  ;;  %1129 = vmatprep.subr.bf16.mxu1 %v1213_v1 }
  0x27   : > { %499 = vmatpush1.bf16.msra.mxu0 %v1156_v11  ;;  %1138 = vmatpush1.bf16.msra.mxu1 %v1156_v11 }
  0x2a   : > { %515 = vmatmul.mubr.bf16.vlgmr.msra.gmra.mrb[0].mxu0 %v1157_v12  ;;  %579 = vmatmul.mubr.bf16.vlgmr.msra.gmra.mrb[0].mxu1 %v1160_v13 }
  0x2b   : > { %944 = vmatprep.mubr.msk.bf16.mxu0 %vm433_vm0, %v1163_v14  ;;  %952 = vmatprep.mubr.msk.bf16.mxu1 %vm433_vm0, %v1165_v15 }
  0x32   : > { %523 = vmatmul.mubr.bf16.gmra.mrb[4].mxu0 %v1167_v16  ;;  %587 = vmatmul.mubr.bf16.gmra.mrb[4].mxu1 %v1168_v17 }
  0x33   : > { %945 = vmatprep.mubr.msk.bf16.mxu0 %vm433_vm0, %v1169_v18  ;;  %953 = vmatprep.mubr.msk.bf16.mxu1 %vm433_vm0, %v1171_v19 }
  0x3a   : > { %531 = vmatmul.mubr.bf16.gmra.mrb[8].mxu0 %v1173_v20  ;;  %595 = vmatmul.mubr.bf16.gmra.mrb[8].mxu1 %v1174_v21 }
  0x3b   : > { %946 = vmatprep.mubr.msk.bf16.mxu0 %vm433_vm0, %v1175_v22  ;;  %954 = vmatprep.mubr.msk.bf16.mxu1 %vm433_vm0, %v1177_v23 }
  0x42   : > { %539 = vmatmul.mubr.bf16.gmra.mrb[12].mxu0 %v1179_v24  ;;  %603 = vmatmul.mubr.bf16.gmra.mrb[12].mxu1 %v1180_v25 }
  0x43   : > { %947 = vmatprep.mubr.msk.bf16.mxu0 %vm433_vm0, %v1181_v26  ;;  %955 = vmatprep.mubr.msk.bf16.mxu1 %vm433_vm0, %v1183_v27 }
  0x4a   : > { %547 = vmatmul.mubr.bf16.gmra.mrb[16].mxu0 %v1185_v28  ;;  %611 = vmatmul.mubr.bf16.gmra.mrb[16].mxu1 %v1186_v29 }
  0x4b   : > { %948 = vmatprep.mubr.msk.bf16.mxu0 %vm433_vm0, %v1187_v30  ;;  %956 = vmatprep.mubr.msk.bf16.mxu1 %vm433_vm0, %v1189_v31 }
  0x52   : > { %555 = vmatmul.mubr.bf16.gmra.mrb[20].mxu0 %v1191_v32  ;;  %619 = vmatmul.mubr.bf16.gmra.mrb[20].mxu1 %v1192_v33 }
  0x53   : > { %949 = vmatprep.mubr.msk.bf16.mxu0 %vm433_vm0, %v1193_v34  ;;  %957 = vmatprep.mubr.msk.bf16.mxu1 %vm433_vm0, %v1195_v35 }
  0x5a   : > { %563 = vmatmul.mubr.bf16.gmra.mrb[24].mxu0 %v1197_v36  ;;  %627 = vmatmul.mubr.bf16.gmra.mrb[24].mxu1 %v1198_v37 }
  0x5b   : > { %950 = vmatprep.mubr.msk.bf16.mxu0 %vm433_vm0, %v1199_v38  ;;  %958 = vmatprep.mubr.msk.bf16.mxu1 %vm433_vm0, %v1201_v39 }
  0x62   : > { %571 = vmatmul.mubr.bf16.gmra.mrb[28].mxu0 %v1203_v40  ;;  %635 = vmatmul.mubr.bf16.gmra.mrb[28].mxu1 %v1204_v41 }
  0xfd   : > { %v516_v43 = vpop.f32.mrb[0].mxu0  ;;  %v580_v44 = vpop.f32.mrb[0].mxu1 }
  0xfe   : > { %v517_v45 = vadd.f32 %v1328_v42, %v516_v43  ;;  %v581_v46 = vadd.f32 %v1328_v42, %v580_v44  ;;  %v518_v47 = vpop.f32.mrb[1].mxu0  ;;  %v582_v48 = vpop.f32.mrb[1].mxu1 }
  0xff   : > { %v519_v49 = vpop.f32.mrb[2].mxu0  ;;  %v583_v50 = vpop.f32.mrb[2].mxu1 }
 0x100   : > { %v520_v51 = vadd.f32 %v1328_v42, %v519_v49  ;;  %v584_v52 = vadd.f32 %v1328_v42, %v583_v50  ;;  %v521_v53 = vpop.f32.mrb[3].mxu0  ;;  %v585_v54 = vpop.f32.mrb[3].mxu1  ;;  %v643_v55 = vmax.f32 %v517_v45, 0.0  ;;  %v659_v56 = vmax.f32 %v581_v46, 0.0 }
 0x102   : > { %v644_v57 = vmax.f32 %v520_v51, 0.0  ;;  %v660_v58 = vmax.f32 %v584_v52, 0.0 }
 0x104   : > { %v1029_v59 = vpack.c.bf16 %v644_v57, %v643_v55  ;;  %v1069_v60 = vpack.c.bf16 %v660_v58, %v659_v56 }
 0x105   : > { %v524_v61 = vpop.f32.mrb[4].mxu0  ;;  %v588_v62 = vpop.f32.mrb[4].mxu1 }
 0x106   : > { %1030 = vst [vmem:[%s1338_s17] sm:$0xff] %v1029_v59   ;;  %1113 = vst [vmem:[%s1338_s17 + $0x40] sm:$0xff] %v1069_v60   ;;  %v525_v63 = vadd.f32 %v1328_v42, %v524_v61  ;;  %v589_v0 = vadd.f32 %v1328_v42, %v588_v62  ;;  %v526_v1 = vpop.f32.mrb[5].mxu0  ;;  %v590_v2 = vpop.f32.mrb[5].mxu1 }
 0x107   : > { %v527_v3 = vpop.f32.mrb[6].mxu0  ;;  %v591_v4 = vpop.f32.mrb[6].mxu1 }
 0x108   : > { %v528_v5 = vadd.f32 %v1328_v42, %v527_v3  ;;  %v592_v6 = vadd.f32 %v1328_v42, %v591_v4  ;;  %v529_v7 = vpop.f32.mrb[7].mxu0  ;;  %v593_v8 = vpop.f32.mrb[7].mxu1  ;;  %v645_v9 = vmax.f32 %v525_v63, 0.0  ;;  %v661_v10 = vmax.f32 %v589_v0, 0.0 }
 0x10a   : > { %v646_v11 = vmax.f32 %v528_v5, 0.0  ;;  %v662_v12 = vmax.f32 %v592_v6, 0.0 }
 0x10c   : > { %v1034_v13 = vpack.c.bf16 %v646_v11, %v645_v9  ;;  %v1074_v14 = vpack.c.bf16 %v662_v12, %v661_v10 }
 0x10d   : > { %v532_v15 = vpop.f32.mrb[8].mxu0  ;;  %v596_v16 = vpop.f32.mrb[8].mxu1 }
 0x10e   : > { %1106 = vst [vmem:[%s1338_s17 + $0x8] sm:$0xff] %v1034_v13   ;;  %1114 = vst [vmem:[%s1338_s17 + $0x48] sm:$0xff] %v1074_v14   ;;  %v533_v17 = vadd.f32 %v1328_v42, %v532_v15  ;;  %v597_v18 = vadd.f32 %v1328_v42, %v596_v16  ;;  %v534_v19 = vpop.f32.mrb[9].mxu0  ;;  %v598_v20 = vpop.f32.mrb[9].mxu1 }
 0x10f   : > { %v535_v21 = vpop.f32.mrb[10].mxu0  ;;  %v599_v22 = vpop.f32.mrb[10].mxu1 }
 0x110   : > { %v536_v23 = vadd.f32 %v1328_v42, %v535_v21  ;;  %v600_v24 = vadd.f32 %v1328_v42, %v599_v22  ;;  %v537_v25 = vpop.f32.mrb[11].mxu0  ;;  %v601_v26 = vpop.f32.mrb[11].mxu1  ;;  %v647_v27 = vmax.f32 %v533_v17, 0.0  ;;  %v663_v28 = vmax.f32 %v597_v18, 0.0 }
 0x112   : > { %v648_v29 = vmax.f32 %v536_v23, 0.0  ;;  %v664_v30 = vmax.f32 %v600_v24, 0.0 }
 0x114   : > { %v1039_v31 = vpack.c.bf16 %v648_v29, %v647_v27  ;;  %v1079_v32 = vpack.c.bf16 %v664_v30, %v663_v28 }
 0x115   : > { %v540_v33 = vpop.f32.mrb[12].mxu0  ;;  %v604_v34 = vpop.f32.mrb[12].mxu1 }
 0x116   : > { %1107 = vst [vmem:[%s1338_s17 + $0x10] sm:$0xff] %v1039_v31   ;;  %1115 = vst [vmem:[%s1338_s17 + $0x50] sm:$0xff] %v1079_v32   ;;  %v541_v35 = vadd.f32 %v1328_v42, %v540_v33  ;;  %v605_v36 = vadd.f32 %v1328_v42, %v604_v34  ;;  %v542_v37 = vpop.f32.mrb[13].mxu0  ;;  %v606_v38 = vpop.f32.mrb[13].mxu1 }
 0x117   : > { %v543_v39 = vpop.f32.mrb[14].mxu0  ;;  %v607_v40 = vpop.f32.mrb[14].mxu1 }
 0x118   : > { %v544_v41 = vadd.f32 %v1328_v42, %v543_v39  ;;  %v608_v43 = vadd.f32 %v1328_v42, %v607_v40  ;;  %v545_v44 = vpop.f32.mrb[15].mxu0  ;;  %v609_v45 = vpop.f32.mrb[15].mxu1  ;;  %v649_v46 = vmax.f32 %v541_v35, 0.0  ;;  %v665_v47 = vmax.f32 %v605_v36, 0.0 }
 0x11a   : > { %v650_v48 = vmax.f32 %v544_v41, 0.0  ;;  %v666_v49 = vmax.f32 %v608_v43, 0.0 }
 0x11c   : > { %v1044_v50 = vpack.c.bf16 %v650_v48, %v649_v46  ;;  %v1084_v51 = vpack.c.bf16 %v666_v49, %v665_v47 }
 0x11d   : > { %v548_v52 = vpop.f32.mrb[16].mxu0  ;;  %v612_v53 = vpop.f32.mrb[16].mxu1 }
 0x11e   : > { %1108 = vst [vmem:[%s1338_s17 + $0x18] sm:$0xff] %v1044_v50   ;;  %1116 = vst [vmem:[%s1338_s17 + $0x58] sm:$0xff] %v1084_v51   ;;  %v549_v54 = vadd.f32 %v1328_v42, %v548_v52  ;;  %v613_v55 = vadd.f32 %v1328_v42, %v612_v53  ;;  %v550_v56 = vpop.f32.mrb[17].mxu0  ;;  %v614_v57 = vpop.f32.mrb[17].mxu1 }
 0x11f   : > { %v551_v58 = vpop.f32.mrb[18].mxu0  ;;  %v615_v59 = vpop.f32.mrb[18].mxu1 }
 0x120   : > { %v552_v60 = vadd.f32 %v1328_v42, %v551_v58  ;;  %v616_v61 = vadd.f32 %v1328_v42, %v615_v59  ;;  %v553_v62 = vpop.f32.mrb[19].mxu0  ;;  %v617_v63 = vpop.f32.mrb[19].mxu1  ;;  %v651_v0 = vmax.f32 %v549_v54, 0.0  ;;  %v667_v1 = vmax.f32 %v613_v55, 0.0 }
 0x122   : > { %v652_v2 = vmax.f32 %v552_v60, 0.0  ;;  %v668_v3 = vmax.f32 %v616_v61, 0.0 }
 0x124   : > { %v1049_v4 = vpack.c.bf16 %v652_v2, %v651_v0  ;;  %v1089_v5 = vpack.c.bf16 %v668_v3, %v667_v1 }
 0x125   : > { %v556_v6 = vpop.f32.mrb[20].mxu0  ;;  %v620_v7 = vpop.f32.mrb[20].mxu1 }
 0x126   : > { %1109 = vst [vmem:[%s1338_s17 + $0x20] sm:$0xff] %v1049_v4   ;;  %1117 = vst [vmem:[%s1338_s17 + $0x60] sm:$0xff] %v1089_v5   ;;  %v557_v8 = vadd.f32 %v1328_v42, %v556_v6  ;;  %v621_v9 = vadd.f32 %v1328_v42, %v620_v7  ;;  %v558_v10 = vpop.f32.mrb[21].mxu0  ;;  %v622_v11 = vpop.f32.mrb[21].mxu1 }
 0x127   : > { %v559_v12 = vpop.f32.mrb[22].mxu0  ;;  %v623_v13 = vpop.f32.mrb[22].mxu1 }
 0x128   : > { %v560_v14 = vadd.f32 %v1328_v42, %v559_v12  ;;  %v624_v15 = vadd.f32 %v1328_v42, %v623_v13  ;;  %v561_v16 = vpop.f32.mrb[23].mxu0  ;;  %v625_v17 = vpop.f32.mrb[23].mxu1  ;;  %v653_v18 = vmax.f32 %v557_v8, 0.0  ;;  %v669_v19 = vmax.f32 %v621_v9, 0.0 }
 0x12a   : > { %v654_v20 = vmax.f32 %v560_v14, 0.0  ;;  %v670_v21 = vmax.f32 %v624_v15, 0.0 }
 0x12c   : > { %v1054_v22 = vpack.c.bf16 %v654_v20, %v653_v18  ;;  %v1094_v23 = vpack.c.bf16 %v670_v21, %v669_v19 }
 0x12d   : > { %v564_v24 = vpop.f32.mrb[24].mxu0  ;;  %v628_v25 = vpop.f32.mrb[24].mxu1 }
 0x12e   : > { %1110 = vst [vmem:[%s1338_s17 + $0x28] sm:$0xff] %v1054_v22   ;;  %1118 = vst [vmem:[%s1338_s17 + $0x68] sm:$0xff] %v1094_v23   ;;  %v565_v26 = vadd.f32 %v1328_v42, %v564_v24  ;;  %v629_v27 = vadd.f32 %v1328_v42, %v628_v25  ;;  %v566_v28 = vpop.f32.mrb[25].mxu0  ;;  %v630_v29 = vpop.f32.mrb[25].mxu1 }
 0x12f   : > { %v567_v30 = vpop.f32.mrb[26].mxu0  ;;  %v631_v31 = vpop.f32.mrb[26].mxu1 }
 0x130   : > { %v568_v32 = vadd.f32 %v1328_v42, %v567_v30  ;;  %v632_v33 = vadd.f32 %v1328_v42, %v631_v31  ;;  %v569_v34 = vpop.f32.mrb[27].mxu0  ;;  %v633_v35 = vpop.f32.mrb[27].mxu1  ;;  %v655_v36 = vmax.f32 %v565_v26, 0.0  ;;  %v671_v37 = vmax.f32 %v629_v27, 0.0 }
 0x132   : > { %v656_v38 = vmax.f32 %v568_v32, 0.0  ;;  %v672_v39 = vmax.f32 %v632_v33, 0.0 }
 0x134   : > { %v1059_v40 = vpack.c.bf16 %v656_v38, %v655_v36  ;;  %v1099_v41 = vpack.c.bf16 %v672_v39, %v671_v37 }
 0x135   : > { %v572_v43 = vpop.f32.mrb[28].mxu0  ;;  %v636_v44 = vpop.f32.mrb[28].mxu1 }
 0x136   : > { %1111 = vst [vmem:[%s1338_s17 + $0x30] sm:$0xff] %v1059_v40   ;;  %1119 = vst [vmem:[%s1338_s17 + $0x70] sm:$0xff] %v1099_v41   ;;  %v573_v45 = vadd.f32 %v1328_v42, %v572_v43  ;;  %v637_v46 = vadd.f32 %v1328_v42, %v636_v44  ;;  %v574_v47 = vpop.f32.mrb[29].mxu0  ;;  %v638_v48 = vpop.f32.mrb[29].mxu1 }
 0x137   : > { %v575_v49 = vpop.f32.mrb[30].mxu0  ;;  %v639_v50 = vpop.f32.mrb[30].mxu1 }
 0x138   : > { %v576_v51 = vadd.f32 %v1328_v42, %v575_v49  ;;  %v640_v52 = vadd.f32 %v1328_v42, %v639_v50  ;;  %v577_v53 = vpop.f32.mrb[31].mxu0  ;;  %v641_v54 = vpop.f32.mrb[31].mxu1  ;;  %v657_v55 = vmax.f32 %v573_v45, 0.0  ;;  %v673_v56 = vmax.f32 %v637_v46, 0.0 }
 0x13a   : > { %v658_v57 = vmax.f32 %v576_v51, 0.0  ;;  %v674_v58 = vmax.f32 %v640_v52, 0.0 }
 0x13c   : > { %v1064_v59 = vpack.c.bf16 %v658_v57, %v657_v55  ;;  %v1104_v60 = vpack.c.bf16 %v674_v58, %v673_v56 }
 0x13e   : > { %1112 = vst [vmem:[%s1338_s17 + $0x38] sm:$0xff] %v1064_v59   ;;  %1120 = vst [vmem:[%s1338_s17 + $0x78] sm:$0xff] %v1104_v60  }
 0x13f PF: > { %s13_s12 = sadd.s32 1, %s1211_s12  }
 0x140   : > { %p10_p4 = scmp.ge.s32.totalorder %s13_s12, 4  }
 0x142   :  { %12 = sbr.rel (!%p10_p4) target bundleno = 1 (0x1), region = 62 }

// kernel: pva_faster_rcnn_forward.6
= control target key start
LH: loop header
LB: loop body
LE: loop exit
PB: predicated region body
PF: predicated region fallthrough
CT: control target
= control target key end

     0   :  { %s634_s12 = smov 0   ;;  %s699_s0 = inlined_call_operand.vmem [shape: bf16[128,144], index: 0, kind: input, shape index: {}]   ;;  %s700_s1 = inlined_call_operand.vmem [shape: bf16[144,128], index: 1, kind: input, shape index: {}]   ;;  %s701_s2 = inlined_call_operand.vmem [shape: f32[1,128], index: 2, kind: input, shape index: {}]   ;;  %s702_s3 = inlined_call_operand.vmem [shape: bf16[128,128], index: 3, kind: output, shape index: {}]  }
   0x1 LB: > { %s483_s13 = sadd.s32 4294967295, %s611_s12   ;;  %p487_p0 = scmp.ge.s32.totalorder %s611_s12, 1  ;;  %s611_s12 = sphi %s634_s12, %s13_s12  }
   0x2   : > { %p139_p1 = scmp.lt.s32.totalorder %s611_s12, 3 }
   0x4   : > { %p140_p2 = pnand %p487_p0, %p139_p1 }
   0x5   : > { %v584_v0 = vld [vmem:[%s700_s1] sm:$0xff] (!%p140_p2)   ;;  %v613_v1 = vmov (!%p140_p2), 0   ;;  %s488_s16 = sshll.u32 (!%p140_p2), %s483_s13, 3  ;;  %v585_v2 = vld [vmem:[%s700_s1 + $0x8] sm:$0xff] (!%p140_p2)   ;;  %v586_v3 = vld [vmem:[%s700_s1 + $0x10] sm:$0xff] (!%p140_p2)   ;;  %vm301_vm0 = vcmask (!%p140_p2), 130048  }
   0x6   : > { %143 = sbr.rel (%p140_p2) target bundleno = 271 (0x10f), region = 32  ;;  %314 = vmatprep.subr.bf16.mxu0 (!%p140_p2), %v613_v1  ;;  %557 = vmatprep.subr.bf16.mxu1 (!%p140_p2), %v613_v1  ;;  %p165_p3 = scmp.lt.s32.totalorder (!%p140_p2), %s488_s16, 15  ;;  %v587_v4 = vld [vmem:[%s700_s1 + $0x18] sm:$0xff] (!%p140_p2)   ;;  %v588_v7 = vld [vmem:[%s700_s1 + $0x20] sm:$0xff] (!%p140_p2)   ;;  %v589_v8 = vld [vmem:[%s700_s1 + $0x28] sm:$0xff] (!%p140_p2)  }
   0x7   : > { %315 = vmatpush1.bf16.msra.mxu0 (!%p140_p2), %v584_v0  ;;  %566 = vmatpush1.bf16.msra.mxu1 (!%p140_p2), %v584_v0  ;;  %v590_v9 = vld [vmem:[%s700_s1 + $0x30] sm:$0xff] (!%p140_p2)   ;;  %v591_v10 = vld [vmem:[%s700_s1 + $0x38] sm:$0xff] (!%p140_p2)   ;;  %v592_v11 = vld [vmem:[%s700_s1 + $0x40] sm:$0xff] (!%p140_p2)  }
   0x8   : > { %316 = vmatprep.subr.bf16.mxu0 (!%p140_p2), %v613_v1  ;;  %558 = vmatprep.subr.bf16.mxu1 (!%p140_p2), %v613_v1  ;;  %v493_v18 = vld [vmem:[%s701_s2] ss:$0 sm:$0xff] (!%p140_p2) }
   0xb   : > { %317 = vmatpush1.bf16.msra.mxu0 (!%p140_p2), %v585_v2  ;;  %567 = vmatpush1.bf16.msra.mxu1 (!%p140_p2), %v585_v2 }
   0xc   : > { %318 = vmatprep.subr.bf16.mxu0 (!%p140_p2), %v613_v1  ;;  %559 = vmatprep.subr.bf16.mxu1 (!%p140_p2), %v613_v1 }
   0xd   : > { %s704_s16 = smov (!%p165_p3, %s488_s16), 15 }
   0xe   : > { %s525_s21 = sshll.u32 %s704_s16, 3  ;;  %s492_s13 = sshll.u32 %s704_s16, 2 }
   0xf   : > { %s657_s24 = scalar_lea.vmem %s699_s0, %s525_s21  ;;  %319 = vmatpush1.bf16.msra.mxu0 %v586_v3  ;;  %568 = vmatpush1.bf16.msra.mxu1 %v586_v3  ;;  %s175_s17 = scalar_lea.vmem %s702_s3, %s492_s13 }
  0x10   : > { %v595_v5 = vld [vmem:[%s657_s24 + $0x4] ss:$8 sps:$4 sm:$0xff]   ;;  %320 = vmatprep.subr.bf16.mxu0 %v613_v1  ;;  %560 = vmatprep.subr.bf16.mxu1 %v613_v1  ;;  %v593_v12 = vld [vmem:[%s657_s24] ss:$8 sps:$4 sm:$0xff]   ;;  %v599_v14 = vld [vmem:[%s657_s24 + $0x14] ss:$8 sps:$4 sm:$0xff]  }
  0x11   : > { %v598_v6 = vld [vmem:[%s657_s24 + $0x24] ss:$8 sps:$4 sm:$0xff]   ;;  %511 = vmatprep.mubr.msk.bf16.mxu0 %vm301_vm0, %v595_v5  ;;  %v596_v13 = vld [vmem:[%s657_s24 + $0x20] ss:$8 sps:$4 sm:$0xff]   ;;  %v601_v15 = vld [vmem:[%s657_s24 + $0x34] ss:$8 sps:$4 sm:$0xff]  }
  0x12   : > { %513 = vmatprep.mubr.msk.bf16.mxu1 %vm301_vm0, %v598_v6  ;;  %v603_v16 = vld [vmem:[%s657_s24 + $0x10] ss:$8 sps:$4 sm:$0xff]  }
  0x13   : > { %321 = vmatpush1.bf16.msra.mxu0 %v587_v4  ;;  %569 = vmatpush1.bf16.msra.mxu1 %v587_v4  ;;  %v604_v17 = vld [vmem:[%s657_s24 + $0x30] ss:$8 sps:$4 sm:$0xff]  }
  0x14   : > { %322 = vmatprep.subr.bf16.mxu0 %v613_v1  ;;  %561 = vmatprep.subr.bf16.mxu1 %v613_v1 }
  0x17   : > { %323 = vmatpush1.bf16.msra.mxu0 %v588_v7  ;;  %570 = vmatpush1.bf16.msra.mxu1 %v588_v7 }
  0x18   : > { %324 = vmatprep.subr.bf16.mxu0 %v613_v1  ;;  %562 = vmatprep.subr.bf16.mxu1 %v613_v1 }
  0x1b   : > { %325 = vmatpush1.bf16.msra.mxu0 %v589_v8  ;;  %571 = vmatpush1.bf16.msra.mxu1 %v589_v8 }
  0x1c   : > { %326 = vmatprep.subr.bf16.mxu0 %v613_v1  ;;  %563 = vmatprep.subr.bf16.mxu1 %v613_v1 }
  0x1f   : > { %327 = vmatpush1.bf16.msra.mxu0 %v590_v9  ;;  %572 = vmatpush1.bf16.msra.mxu1 %v590_v9 }
  0x20   : > { %328 = vmatprep.subr.bf16.mxu0 %v613_v1  ;;  %564 = vmatprep.subr.bf16.mxu1 %v613_v1 }
  0x23   : > { %329 = vmatpush1.bf16.msra.mxu0 %v591_v10  ;;  %573 = vmatpush1.bf16.msra.mxu1 %v591_v10 }
  0x24   : > { %330 = vmatprep.subr.bf16.mxu0 %v613_v1  ;;  %565 = vmatprep.subr.bf16.mxu1 %v613_v1 }
  0x27   : > { %331 = vmatpush1.bf16.msra.mxu0 %v592_v11  ;;  %574 = vmatpush1.bf16.msra.mxu1 %v592_v11 }
  0x2a   : > { %347 = vmatmul.mubr.bf16.vlgmr.msra.gmra.mrb[0].mxu0 %v593_v12  ;;  %363 = vmatmul.mubr.bf16.vlgmr.msra.gmra.mrb[0].mxu1 %v596_v13 }
  0x2b   : > { %512 = vmatprep.mubr.msk.bf16.mxu0 %vm301_vm0, %v599_v14  ;;  %514 = vmatprep.mubr.msk.bf16.mxu1 %vm301_vm0, %v601_v15 }
  0x32   : > { %355 = vmatmul.mubr.bf16.gmra.mrb[4].mxu0 %v603_v16  ;;  %371 = vmatmul.mubr.bf16.gmra.mrb[4].mxu1 %v604_v17 }
  0xfd   : > { %v348_v19 = vpop.f32.mrb[0].mxu0  ;;  %v364_v20 = vpop.f32.mrb[0].mxu1 }
  0xfe   : > { %v349_v21 = vadd.f32 %v493_v18, %v348_v19  ;;  %v365_v22 = vadd.f32 %v493_v18, %v364_v20  ;;  %v350_v23 = vpop.f32.mrb[1].mxu0  ;;  %v366_v24 = vpop.f32.mrb[1].mxu1 }
  0xff   : > { %v351_v25 = vpop.f32.mrb[2].mxu0  ;;  %v367_v26 = vpop.f32.mrb[2].mxu1 }
 0x100   : > { %v352_v27 = vadd.f32 %v493_v18, %v351_v25  ;;  %v368_v28 = vadd.f32 %v493_v18, %v367_v26  ;;  %v353_v29 = vpop.f32.mrb[3].mxu0  ;;  %v369_v30 = vpop.f32.mrb[3].mxu1  ;;  %v379_v31 = vmax.f32 %v349_v21, 0.0  ;;  %v383_v32 = vmax.f32 %v365_v22, 0.0 }
 0x102   : > { %v380_v33 = vmax.f32 %v352_v27, 0.0  ;;  %v384_v34 = vmax.f32 %v368_v28, 0.0 }
 0x104   : > { %v537_v35 = vpack.c.bf16 %v380_v33, %v379_v31  ;;  %v547_v36 = vpack.c.bf16 %v384_v34, %v383_v32 }
 0x105   : > { %v356_v37 = vpop.f32.mrb[4].mxu0  ;;  %v372_v38 = vpop.f32.mrb[4].mxu1 }
 0x106   : > { %538 = vst [vmem:[%s175_s17] sm:$0xff] %v537_v35   ;;  %555 = vst [vmem:[%s175_s17 + $0x10] sm:$0xff] %v547_v36   ;;  %v357_v39 = vadd.f32 %v493_v18, %v356_v37  ;;  %v373_v40 = vadd.f32 %v493_v18, %v372_v38  ;;  %v358_v41 = vpop.f32.mrb[5].mxu0  ;;  %v374_v42 = vpop.f32.mrb[5].mxu1 }
 0x107   : > { %v359_v43 = vpop.f32.mrb[6].mxu0  ;;  %v375_v44 = vpop.f32.mrb[6].mxu1 }
 0x108   : > { %v360_v45 = vadd.f32 %v493_v18, %v359_v43  ;;  %v376_v46 = vadd.f32 %v493_v18, %v375_v44  ;;  %v361_v47 = vpop.f32.mrb[7].mxu0  ;;  %v377_v48 = vpop.f32.mrb[7].mxu1  ;;  %v381_v49 = vmax.f32 %v357_v39, 0.0  ;;  %v385_v50 = vmax.f32 %v373_v40, 0.0 }
 0x10a   : > { %v382_v51 = vmax.f32 %v360_v45, 0.0  ;;  %v386_v52 = vmax.f32 %v376_v46, 0.0 }
 0x10c   : > { %v542_v53 = vpack.c.bf16 %v382_v51, %v381_v49  ;;  %v552_v54 = vpack.c.bf16 %v386_v52, %v385_v50 }
 0x10e   : > { %554 = vst [vmem:[%s175_s17 + $0x8] sm:$0xff] %v542_v53   ;;  %556 = vst [vmem:[%s175_s17 + $0x18] sm:$0xff] %v552_v54  }
 0x10f PF: > { %s13_s12 = sadd.s32 1, %s611_s12  }
 0x110   : > { %p10_p4 = scmp.ge.s32.totalorder %s13_s12, 4  }
 0x112   :  { %12 = sbr.rel (!%p10_p4) target bundleno = 1 (0x1), region = 62 }

// kernel: pva_faster_rcnn_forward.7
= control target key start
LH: loop header
LB: loop body
LE: loop exit
PB: predicated region body
PF: predicated region fallthrough
CT: control target
= control target key end

     0   :  { %s641_s12 = smov 0   ;;  %s719_s0 = inlined_call_operand.vmem [shape: bf16[32,288], index: 0, kind: input, shape index: {}]   ;;  %s720_s1 = inlined_call_operand.vmem [shape: bf16[288,128], index: 1, kind: input, shape index: {}]   ;;  %s721_s2 = inlined_call_operand.vmem [shape: f32[1,128], index: 2, kind: input, shape index: {}]   ;;  %s722_s3 = inlined_call_operand.vmem [shape: bf16[32,128], index: 3, kind: output, shape index: {}]  }
   0x1 LB: > { %s502_s13 = sadd.s32 4294967295, %s617_s12   ;;  %p506_p0 = scmp.ge.s32.totalorder %s617_s12, 1  ;;  %s617_s12 = sphi %s641_s12, %s13_s12  }
   0x2   : > { %p139_p1 = scmp.lt.s32.totalorder %s617_s12, 3 }
   0x4   : > { %p140_p2 = pnand %p506_p0, %p139_p1 }
   0x5   : > { %v589_v0 = vld [vmem:[%s720_s1 + $0x40] sm:$0xff] (!%p140_p2)   ;;  %v619_v2 = vmov (!%p140_p2), 0.0   ;;  %s507_s18 = sshll.u32 (!%p140_p2), %s502_s13, 1  ;;  %v591_v3 = vld [vmem:[%s720_s1 + $0x48] sm:$0xff] (!%p140_p2)   ;;  %v593_v5 = vld [vmem:[%s720_s1 + $0x50] sm:$0xff] (!%p140_p2)   ;;  %vm620_vm0 = vmmov (!%p140_p2), 0  }
   0x6   : > { %143 = sbr.rel (%p140_p2) target bundleno = 264 (0x108), region = 32  ;;  %v590_v1 = vld [vmem:[%s720_s1] sm:$0xff] (!%p140_p2)   ;;  %570 = vmatprep.subr.bf16.mxu1 (!%p140_p2), %v619_v2  ;;  %545 = vmatprep.subr.bf16.mxu0 (!%p140_p2), %v589_v0  ;;  %p165_p3 = scmp.lt.s32.totalorder (!%p140_p2), %s507_s18, 3  ;;  %v592_v4 = vld [vmem:[%s720_s1 + $0x8] sm:$0xff] (!%p140_p2)   ;;  %v594_v6 = vld [vmem:[%s720_s1 + $0x10] sm:$0xff] (!%p140_p2)   ;;  %vm348_vm1 = vcmask (!%p140_p2), 261120  }
   0x7   : > { %546 = vmatpush3.bf16.msra.mxu0 (!%p140_p2), %v590_v1  ;;  %574 = vmatprep.mubr.msk.bf16.mxu1 (!%p140_p2), %vm620_vm0, %v619_v2  ;;  %v595_v7 = vld [vmem:[%s720_s1 + $0x58] sm:$0xff] (!%p140_p2)   ;;  %v597_v9 = vld [vmem:[%s720_s1 + $0x60] sm:$0xff] (!%p140_p2)   ;;  %v599_v12 = vld [vmem:[%s720_s1 + $0x68] sm:$0xff] (!%p140_p2)  }
   0x8   : > { %547 = vmatprep.subr.bf16.mxu0 (!%p140_p2), %v591_v3  ;;  %v596_v8 = vld [vmem:[%s720_s1 + $0x18] sm:$0xff] (!%p140_p2)   ;;  %v603_v10 = vld [vmem:[%s720_s1 + $0x80] sm:$0xff] (!%p140_p2)   ;;  %v600_v13 = vld [vmem:[%s720_s1 + $0x28] sm:$0xff] (!%p140_p2)  }
   0x9   : > { %v598_v11 = vld [vmem:[%s720_s1 + $0x20] sm:$0xff] (!%p140_p2)   ;;  %571 = vmatpush3.bf16.msra.mxu1 (!%p140_p2), %v603_v10  ;;  %v609_v15 = vld [vmem:[%s720_s1 + $0x88] sm:$0xff] (!%p140_p2)   ;;  %v601_v16 = vld [vmem:[%s720_s1 + $0x70] sm:$0xff] (!%p140_p2)  }
   0xa   : > { %572 = vmatprep.subr.bf16.mxu1 (!%p140_p2), %v619_v2  ;;  %v602_v18 = vld [vmem:[%s720_s1 + $0x30] sm:$0xff] (!%p140_p2)   ;;  %v604_v19 = vld [vmem:[%s720_s1 + $0x78] sm:$0xff] (!%p140_p2)   ;;  %v511_v28 = vld [vmem:[%s721_s2] ss:$0 sm:$0xff] (!%p140_p2) }
   0xb   : > { %548 = vmatpush3.bf16.msra.mxu0 (!%p140_p2), %v592_v4  ;;  %v605_v20 = vld [vmem:[%s720_s1 + $0x38] sm:$0xff] (!%p140_p2)  }
   0xc   : > { %549 = vmatprep.subr.bf16.mxu0 (!%p140_p2), %v593_v5 }
   0xd   : > { %s724_s18 = smov (!%p165_p3, %s507_s18), 3  ;;  %573 = vmatpush3.bf16.msra.mxu1 %v609_v15 }
   0xe   : > { %s578_s4 = smul.u32 12, %s724_s18  ;;  %s510_s5 = sshll.u32 %s724_s18, 2 }
   0xf   : > { %550 = vmatpush3.bf16.msra.mxu0 %v594_v6  ;;  %s175_s8 = scalar_lea.vmem %s722_s3, %s510_s5 }
  0x10   : > { %551 = vmatprep.subr.bf16.mxu0 %v595_v7  ;;  %s169_s14 = scalar_lea.vmem %s719_s0, %s578_s4 }
  0x11   : > { %v608_v14 = vld [vmem:[%s169_s14 + $0x4] ss:$12 sps:$4 sm:$0xff]   ;;  %v610_v17 = vld [vmem:[%s169_s14 + $0x8] ss:$12 sps:$4 sm:$0xff]   ;;  %v606_v21 = vld [vmem:[%s169_s14] ss:$12 sps:$4 sm:$0xff]  }
  0x12   : > { %384 = vmatprep.mubr.bf16.mxu0 %v608_v14  ;;  %575 = vmatmul.mubr.msk.bf16.vlgmr.msra.gmra.mrb[0].mxu1 %vm348_vm1, %v610_v17 }
  0x13   : > { %552 = vmatpush3.bf16.msra.mxu0 %v596_v8 }
  0x14   : > { %553 = vmatprep.subr.bf16.mxu0 %v597_v9 }
  0x17   : > { %554 = vmatpush3.bf16.msra.mxu0 %v598_v11 }
  0x18   : > { %555 = vmatprep.subr.bf16.mxu0 %v599_v12 }
  0x1b   : > { %556 = vmatpush3.bf16.msra.mxu0 %v600_v13 }
  0x1c   : > { %557 = vmatprep.subr.bf16.mxu0 %v601_v16 }
  0x1f   : > { %558 = vmatpush3.bf16.msra.mxu0 %v602_v18 }
  0x20   : > { %559 = vmatprep.subr.bf16.mxu0 %v604_v19 }
  0x23   : > { %560 = vmatpush3.bf16.msra.mxu0 %v605_v20 }
  0x26   : > { %385 = vmatmul.mubr.bf16.vlgmr.msra.gmra.mrb[0].mxu0 %v606_v21 }
  0xe5   : > { %v427_v22 = vpop.f32.mrb[0].mxu1 }
  0xe6   : > { %v576_v23 = vpop.f32.mrb[1].mxu1 }
  0xe7   : > { %v430_v24 = vpop.f32.mrb[2].mxu1 }
  0xe8   : > { %v577_v25 = vpop.f32.mrb[3].mxu1 }
  0xf9   : > { %v561_v26 = vpop.f32.mrb[0].mxu0 }
  0xfa   : > { %v562_v27 = vpop.f32.mrb[1].mxu0 }
  0xfb   : > { %v563_v29 = vadd.f32 %v562_v27, %v561_v26  ;;  %v564_v30 = vpop.f32.mrb[2].mxu0 }
  0xfc   : > { %v565_v31 = vpop.f32.mrb[3].mxu0 }
  0xfd   : > { %v387_v32 = vadd.f32 %v563_v29, %v511_v28  ;;  %v566_v33 = vadd.f32 %v565_v31, %v564_v30 }
  0xff   : > { %v428_v34 = vadd.f32 %v427_v22, %v387_v32  ;;  %v390_v35 = vadd.f32 %v566_v33, %v511_v28 }
 0x101   : > { %v431_v36 = vadd.f32 %v430_v24, %v390_v35  ;;  %v434_v37 = vmax.f32 %v428_v34, 0.0 }
 0x103   : > { %v435_v38 = vmax.f32 %v431_v36, 0.0 }
 0x105   : > { %v543_v39 = vpack.c.bf16 %v435_v38, %v434_v37 }
 0x107   : > { %544 = vst [vmem:[%s175_s8] sm:$0xff] %v543_v39  }
 0x108 PF: > { %s13_s12 = sadd.s32 1, %s617_s12  }
 0x109   : > { %p10_p4 = scmp.ge.s32.totalorder %s13_s12, 4  }
 0x10b   :  { %12 = sbr.rel (!%p10_p4) target bundleno = 1 (0x1), region = 62 }

// kernel: pva_faster_rcnn_forward.8
= control target key start
LH: loop header
LB: loop body
LE: loop exit
PB: predicated region body
PF: predicated region fallthrough
CT: control target
= control target key end

     0   :  { %s872_s18 = smov 0   ;;  %s996_s0 = inlined_call_operand.vmem [shape: bf16[32,288], index: 0, kind: input, shape index: {}]   ;;  %s997_s1 = inlined_call_operand.vmem [shape: bf16[288,128], index: 1, kind: input, shape index: {}]   ;;  %s998_s2 = inlined_call_operand.vmem [shape: f32[1,128], index: 2, kind: input, shape index: {}]   ;;  %s999_s3 = inlined_call_operand.vmem [shape: bf16[128,128], index: 3, kind: input, shape index: {}]   ;;  %s1000_s4 = inlined_call_operand.vmem [shape: f32[1,128], index: 4, kind: input, shape index: {}]   ;;  %s1001_s5 = inlined_call_operand.vmem [shape: f32[32,128], index: 5, kind: output, shape index: {}]  }
   0x1 LB: > { %s678_s19 = sadd.s32 4294967295, %s838_s18   ;;  %p682_p0 = scmp.ge.s32.totalorder %s838_s18, 1  ;;  %s838_s18 = sphi %s872_s18, %s15_s18  }
   0x2   : > { %p189_p1 = scmp.lt.s32.totalorder %s838_s18, 3 }
   0x4   : > { %p190_p2 = pnand %p682_p0, %p189_p1 }
   0x5   : > { %v794_v0 = vld [vmem:[%s997_s1 + $0x40] sm:$0xff] (!%p190_p2)   ;;  %v840_v2 = vmov (!%p190_p2), 0.0   ;;  %s683_s24 = sshll.u32 (!%p190_p2), %s678_s19, 1  ;;  %v796_v3 = vld [vmem:[%s997_s1 + $0x48] sm:$0xff] (!%p190_p2)   ;;  %v798_v5 = vld [vmem:[%s997_s1 + $0x50] sm:$0xff] (!%p190_p2)   ;;  %vm841_vm0 = vmmov (!%p190_p2), 0   ;;  %v603_v62 = vlaneseq (!%p190_p2) }
   0x6   : > { %193 = sbr.rel (%p190_p2) target bundleno = 509 (0x1fd), region = 40  ;;  %v795_v1 = vld [vmem:[%s997_s1] sm:$0xff] (!%p190_p2)   ;;  %755 = vmatprep.subr.bf16.mxu1 (!%p190_p2), %v840_v2  ;;  %721 = vmatprep.subr.bf16.mxu0 (!%p190_p2), %v794_v0  ;;  %p219_p3 = scmp.lt.s32.totalorder (!%p190_p2), %s683_s24, 3  ;;  %v797_v4 = vld [vmem:[%s997_s1 + $0x8] sm:$0xff] (!%p190_p2)   ;;  %v799_v6 = vld [vmem:[%s997_s1 + $0x10] sm:$0xff] (!%p190_p2)   ;;  %vm402_vm1 = vcmask (!%p190_p2), 261120  }
   0x7   : > { %722 = vmatpush3.bf16.msra.mxu0 (!%p190_p2), %v795_v1  ;;  %759 = vmatprep.mubr.msk.bf16.mxu1 (!%p190_p2), %vm841_vm0, %v840_v2  ;;  %v800_v7 = vld [vmem:[%s997_s1 + $0x58] sm:$0xff] (!%p190_p2)   ;;  %v802_v9 = vld [vmem:[%s997_s1 + $0x60] sm:$0xff] (!%p190_p2)   ;;  %v804_v12 = vld [vmem:[%s997_s1 + $0x68] sm:$0xff] (!%p190_p2)   ;;  %v604_v0 = vand.u32 (!%p190_p2), 127, %v603_v62 }
   0x8   : > { %723 = vmatprep.subr.bf16.mxu0 (!%p190_p2), %v796_v3  ;;  %v801_v8 = vld [vmem:[%s997_s1 + $0x18] sm:$0xff] (!%p190_p2)   ;;  %v808_v10 = vld [vmem:[%s997_s1 + $0x80] sm:$0xff] (!%p190_p2)   ;;  %v805_v13 = vld [vmem:[%s997_s1 + $0x28] sm:$0xff] (!%p190_p2)  }
   0x9   : > { %v803_v11 = vld [vmem:[%s997_s1 + $0x20] sm:$0xff] (!%p190_p2)   ;;  %756 = vmatpush3.bf16.msra.mxu1 (!%p190_p2), %v808_v10  ;;  %v806_v14 = vld [vmem:[%s997_s1 + $0x70] sm:$0xff] (!%p190_p2)   ;;  %v814_v16 = vld [vmem:[%s997_s1 + $0x88] sm:$0xff] (!%p190_p2)   ;;  %vm617_vm2 = vcmp.lt.s32.totalorder (!%p190_p2), %v604_v0, 3 }
   0xa   : > { %757 = vmatprep.subr.bf16.mxu1 (!%p190_p2), %v840_v2  ;;  %v816_v18 = vld [vmem:[%s999_s3] sm:$0xff] (!%p190_p2)   ;;  %v807_v19 = vld [vmem:[%s997_s1 + $0x30] sm:$0xff] (!%p190_p2)   ;;  %v809_v20 = vld [vmem:[%s997_s1 + $0x78] sm:$0xff] (!%p190_p2)  }
   0xb   : > { %724 = vmatpush3.bf16.msra.mxu0 (!%p190_p2), %v797_v4  ;;  %v817_v21 = vld [vmem:[%s999_s3 + $0x8] sm:$0xff] (!%p190_p2)   ;;  %v810_v22 = vld [vmem:[%s997_s1 + $0x38] sm:$0xff] (!%p190_p2)   ;;  %v818_v23 = vld [vmem:[%s999_s3 + $0x10] sm:$0xff] (!%p190_p2)  }
   0xc   : > { %725 = vmatprep.subr.bf16.mxu0 (!%p190_p2), %v798_v5  ;;  %v819_v25 = vld [vmem:[%s999_s3 + $0x18] sm:$0xff] (!%p190_p2)   ;;  %v820_v26 = vld [vmem:[%s999_s3 + $0x20] sm:$0xff] (!%p190_p2)   ;;  %v821_v27 = vld [vmem:[%s999_s3 + $0x28] sm:$0xff] (!%p190_p2)  }
   0xd   : > { %s1003_s24 = smov (!%p219_p3, %s683_s24), 3  ;;  %758 = vmatpush3.bf16.msra.mxu1 %v814_v16  ;;  %v822_v28 = vld [vmem:[%s999_s3 + $0x30] sm:$0xff]   ;;  %v823_v29 = vld [vmem:[%s999_s3 + $0x38] sm:$0xff]   ;;  %v687_v36 = vld [vmem:[%s998_s2] ss:$0 sm:$0xff] }
   0xe   : > { %s783_s12 = smul.u32 12, %s1003_s24  ;;  %763 = vmatprep.subr.bf16.mxu1 %v840_v2  ;;  %v710_v48 = vld [vmem:[%s1000_s4] ss:$0 sm:$0xff]  ;;  %s686_s10 = sshll.u32 %s1003_s24, 3 }
   0xf   : > { %726 = vmatpush3.bf16.msra.mxu0 %v799_v6  ;;  %s229_s13 = scalar_lea.vmem %s1001_s5, %s686_s10 }
  0x10   : > { %727 = vmatprep.subr.bf16.mxu0 %v800_v7  ;;  %s922_s22 = scalar_lea.vmem %s996_s0, %s783_s12 }
  0x11   : > { %v813_v15 = vld [vmem:[%s922_s22 + $0x4] ss:$12 sps:$4 sm:$0xff]   ;;  %v815_v17 = vld [vmem:[%s922_s22 + $0x8] ss:$12 sps:$4 sm:$0xff]   ;;  %v811_v24 = vld [vmem:[%s922_s22] ss:$12 sps:$4 sm:$0xff]  }
  0x12   : > { %438 = vmatprep.mubr.bf16.mxu0 %v813_v15  ;;  %760 = vmatmul.mubr.msk.bf16.vlgmr.msra.gmra.mrb[0].mxu1 %vm402_vm1, %v815_v17 }
  0x13   : > { %728 = vmatpush3.bf16.msra.mxu0 %v801_v8  ;;  %764 = vmatpush3.bf16.msra.mxu1 %v816_v18 }
  0x14   : > { %729 = vmatprep.subr.bf16.mxu0 %v802_v9  ;;  %779 = vmatprep.mubr.msk.bf16.mxu1 %vm841_vm0, %v840_v2 }
  0x15   : > { %765 = vmatprep.subr.bf16.mxu1 %v840_v2 }
  0x17   : > { %730 = vmatpush3.bf16.msra.mxu0 %v803_v11  ;;  %766 = vmatpush3.bf16.msra.mxu1 %v817_v21 }
  0x18   : > { %731 = vmatprep.subr.bf16.mxu0 %v804_v12  ;;  %767 = vmatprep.subr.bf16.mxu1 %v840_v2 }
  0x1b   : > { %732 = vmatpush3.bf16.msra.mxu0 %v805_v13  ;;  %768 = vmatpush3.bf16.msra.mxu1 %v818_v23 }
  0x1c   : > { %733 = vmatprep.subr.bf16.mxu0 %v806_v14  ;;  %769 = vmatprep.subr.bf16.mxu1 %v840_v2 }
  0x1f   : > { %734 = vmatpush3.bf16.msra.mxu0 %v807_v19  ;;  %770 = vmatpush3.bf16.msra.mxu1 %v819_v25 }
  0x20   : > { %735 = vmatprep.subr.bf16.mxu0 %v809_v20  ;;  %771 = vmatprep.subr.bf16.mxu1 %v840_v2 }
  0x23   : > { %736 = vmatpush3.bf16.msra.mxu0 %v810_v22  ;;  %772 = vmatpush3.bf16.msra.mxu1 %v820_v26 }
  0x24   : > { %773 = vmatprep.subr.bf16.mxu1 %v840_v2 }
  0x26   : > { %439 = vmatmul.mubr.bf16.vlgmr.msra.gmra.mrb[0].mxu0 %v811_v24 }
  0x27   : > { %774 = vmatpush3.bf16.msra.mxu1 %v821_v27 }
  0x28   : > { %775 = vmatprep.subr.bf16.mxu1 %v840_v2 }
  0x2b   : > { %776 = vmatpush3.bf16.msra.mxu1 %v822_v28 }
  0x2c   : > { %777 = vmatprep.subr.bf16.mxu1 %v840_v2 }
  0x2f   : > { %778 = vmatpush3.bf16.msra.mxu1 %v823_v29 }
  0xe5   : > { %v481_v30 = vpop.f32.mrb[0].mxu1 }
  0xe6   : > { %v761_v31 = vpop.f32.mrb[1].mxu1 }
  0xe7   : > { %v484_v32 = vpop.f32.mrb[2].mxu1 }
  0xe8   : > { %v762_v33 = vpop.f32.mrb[3].mxu1 }
  0xf9   : > { %v737_v34 = vpop.f32.mrb[0].mxu0 }
  0xfa   : > { %v738_v35 = vpop.f32.mrb[1].mxu0 }
  0xfb   : > { %v739_v37 = vadd.f32 %v738_v35, %v737_v34  ;;  %v740_v38 = vpop.f32.mrb[2].mxu0 }
  0xfc   : > { %v741_v39 = vpop.f32.mrb[3].mxu0 }
  0xfd   : > { %v441_v40 = vadd.f32 %v739_v37, %v687_v36  ;;  %v742_v41 = vadd.f32 %v741_v39, %v740_v38 }
  0xff   : > { %v482_v42 = vadd.f32 %v481_v30, %v441_v40  ;;  %v444_v43 = vadd.f32 %v742_v41, %v687_v36 }
 0x101   : > { %v485_v44 = vadd.f32 %v484_v32, %v444_v43  ;;  %v488_v45 = vmax.f32 %v482_v42, 0.0 }
 0x103   : > { %v489_v46 = vmax.f32 %v485_v44, 0.0 }
 0x105   : > { %v490_v47 = vpack.c.bf16 %v489_v46, %v488_v45 }
 0x107   : > { %780 = vmatmul.mubr.bf16.vlgmr.msra.gmra.mrb[4].mxu1 %v490_v47 }
 0x1da   : > { %v596_v49 = vpop.f32.mrb[4].mxu1 }
 0x1db   : > { %v597_v50 = vadd.f32 %v710_v48, %v596_v49  ;;  %v781_v51 = vpop.f32.mrb[5].mxu1 }
 0x1dc   : > { %v599_v52 = vpop.f32.mrb[6].mxu1 }
 0x1dd   : > { %v605_v53 = vsub.f32 0.0, %v597_v50  ;;  %v600_v54 = vadd.f32 %v710_v48, %v599_v52  ;;  %v782_v55 = vpop.f32.mrb[7].mxu1 }
 0x1df   : > { %v607_v56 = vmul.f32 1.442695, %v605_v53  ;;  %v606_v57 = vsub.f32 0.0, %v600_v54 }
 0x1e1   : > { %824 = vpow2.f32 %v607_v56  ;;  %v609_v58 = vmul.f32 1.442695, %v606_v57 }
 0x1e3   : > { %826 = vpow2.f32 %v609_v58 }
 0x1eb   : > { %v825_v59 = vpop.eup %824 }
 0x1ec   : > { %v611_v60 = vadd.f32 1.0, %v825_v59 }
 0x1ed   : > { %v827_v61 = vpop.eup %826 }
 0x1ee   : > { %828 = vrcp.f32 %v611_v60  ;;  %v612_v63 = vadd.f32 1.0, %v827_v61 }
 0x1f0   : > { %830 = vrcp.f32 %v612_v63 }
 0x1f8   : > { %v829_v1 = vpop.eup %828 }
 0x1f9   : > { %v618_v2 = vsel %vm617_vm2, %v829_v1, %v597_v50 }
 0x1fa   : > { %v831_v3 = vpop.eup %830  ;;  %620 = vst [vmem:[%s229_s13] sm:$0xff] %v618_v2 }
 0x1fb   : > { %v619_v4 = vsel %vm617_vm2, %v831_v3, %v600_v54 }
 0x1fc   : > { %621 = vst [vmem:[%s229_s13 + $0x8] sm:$0xff] %v619_v4 }
 0x1fd PF: > { %s15_s18 = sadd.s32 1, %s838_s18  }
 0x1fe   : > { %p12_p4 = scmp.ge.s32.totalorder %s15_s18, 4  }
 0x200   :  { %14 = sbr.rel (!%p12_p4) target bundleno = 1 (0x1), region = 70 }

// kernel: pva_faster_rcnn_forward.9
= control target key start
LH: loop header
LB: loop body
LE: loop exit
PB: predicated region body
PF: predicated region fallthrough
CT: control target
= control target key end

     0   :  { %s1199_s24 = smov 0   ;;  %s1397_s0 = inlined_call_operand.vmem [shape: f32[16,512], index: 0, kind: input, shape index: {}]   ;;  %s1398_s1 = inlined_call_operand.vmem [shape: bf16[512,128], index: 1, kind: input, shape index: {}]   ;;  %s1399_s2 = inlined_call_operand.vmem [shape: f32[1,128], index: 2, kind: input, shape index: {}]   ;;  %s1400_s3 = inlined_call_operand.vmem [shape: bf16[128,128], index: 3, kind: input, shape index: {}]   ;;  %s1401_s4 = inlined_call_operand.vmem [shape: f32[1,128], index: 4, kind: input, shape index: {}]   ;;  %s1402_s5 = inlined_call_operand.vmem [shape: bf16[128,128], index: 5, kind: input, shape index: {}]   ;;  %s1403_s6 = inlined_call_operand.vmem [shape: f32[1,128], index: 6, kind: input, shape index: {}]   ;;  %s1404_s7 = inlined_call_operand.vmem [shape: f32[16,128], index: 7, kind: output, shape index: {}]  }
   0x1 LB: > { %s923_s25 = sadd.s32 4294967295, %s1155_s24   ;;  %p927_p0 = scmp.ge.s32.totalorder %s1155_s24, 1  ;;  %s1155_s24 = sphi %s1199_s24, %s17_s24  }
   0x2   : > { %p237_p1 = scmp.lt.s32.totalorder %s1155_s24, 3 }
   0x4   : > { %p238_p2 = pnand %p927_p0, %p237_p1 }
   0x5   : > { %v1097_v0 = vld [vmem:[%s1398_s1 + $0x40] sm:$0xff] (!%p238_p2)   ;;  %v1101_v4 = vld [vmem:[%s1398_s1 + $0x48] sm:$0xff] (!%p238_p2)   ;;  %v1105_v8 = vld [vmem:[%s1398_s1 + $0x50] sm:$0xff] (!%p238_p2)   ;;  %p268_p3 = scmp.lt.s32.totalorder (!%p238_p2), %s923_s25, 1  ;;  %v1157_v39 = vmov (!%p238_p2), 0.0   ;;  %vm1158_vm0 = vmmov (!%p238_p2), 0  }
   0x6   : > { %241 = sbr.rel (%p238_p2) target bundleno = 1009 (0x3f1), region = 48  ;;  %v1098_v1 = vld [vmem:[%s1398_s1 + $0xc0] sm:$0xff] (!%p238_p2)   ;;  %985 = vmatprep.subr.bf16.mxu0 (!%p238_p2), %v1097_v0  ;;  %v1102_v5 = vld [vmem:[%s1398_s1 + $0xc8] sm:$0xff] (!%p238_p2)   ;;  %v1106_v9 = vld [vmem:[%s1398_s1 + $0xd0] sm:$0xff] (!%p238_p2)  }
   0x7   : > { %v1099_v2 = vld [vmem:[%s1398_s1] sm:$0xff] (!%p238_p2)   ;;  %1007 = vmatprep.subr.bf16.mxu1 (!%p238_p2), %v1098_v1  ;;  %v1103_v6 = vld [vmem:[%s1398_s1 + $0x8] sm:$0xff] (!%p238_p2)   ;;  %v1107_v10 = vld [vmem:[%s1398_s1 + $0x10] sm:$0xff] (!%p238_p2)  }
   0x8   : > { %v1100_v3 = vld [vmem:[%s1398_s1 + $0x80] sm:$0xff] (!%p238_p2)   ;;  %986 = vmatpush3.bf16.msra.mxu0 (!%p238_p2), %v1099_v2  ;;  %v1104_v7 = vld [vmem:[%s1398_s1 + $0x88] sm:$0xff] (!%p238_p2)   ;;  %v1108_v11 = vld [vmem:[%s1398_s1 + $0x90] sm:$0xff] (!%p238_p2)  }
   0x9   : > { %1008 = vmatpush3.bf16.msra.mxu1 (!%p238_p2), %v1100_v3  ;;  %987 = vmatprep.subr.bf16.mxu0 (!%p238_p2), %v1101_v4  ;;  %v1109_v12 = vld [vmem:[%s1398_s1 + $0x58] sm:$0xff] (!%p238_p2)   ;;  %v1113_v16 = vld [vmem:[%s1398_s1 + $0x60] sm:$0xff] (!%p238_p2)   ;;  %v1117_v20 = vld [vmem:[%s1398_s1 + $0x68] sm:$0xff] (!%p238_p2)  }
   0xa   : > { %1009 = vmatprep.subr.bf16.mxu1 (!%p238_p2), %v1102_v5  ;;  %v1110_v13 = vld [vmem:[%s1398_s1 + $0xd8] sm:$0xff] (!%p238_p2)   ;;  %v1114_v17 = vld [vmem:[%s1398_s1 + $0xe0] sm:$0xff] (!%p238_p2)   ;;  %v1118_v21 = vld [vmem:[%s1398_s1 + $0xe8] sm:$0xff] (!%p238_p2)  }
   0xb   : > { %v1111_v14 = vld [vmem:[%s1398_s1 + $0x18] sm:$0xff] (!%p238_p2)   ;;  %v1115_v18 = vld [vmem:[%s1398_s1 + $0x20] sm:$0xff] (!%p238_p2)   ;;  %v1119_v22 = vld [vmem:[%s1398_s1 + $0x28] sm:$0xff] (!%p238_p2)  }
   0xc   : > { %988 = vmatpush3.bf16.msra.mxu0 (!%p238_p2), %v1103_v6  ;;  %v1112_v15 = vld [vmem:[%s1398_s1 + $0x98] sm:$0xff] (!%p238_p2)   ;;  %v1116_v19 = vld [vmem:[%s1398_s1 + $0xa0] sm:$0xff] (!%p238_p2)   ;;  %v1120_v23 = vld [vmem:[%s1398_s1 + $0xa8] sm:$0xff] (!%p238_p2)  }
   0xd   : > { %1010 = vmatpush3.bf16.msra.mxu1 %v1104_v7  ;;  %989 = vmatprep.subr.bf16.mxu0 %v1105_v8  ;;  %s1406_s25 = smov (!%p268_p3, %s923_s25), 1  ;;  %v1121_v24 = vld [vmem:[%s1398_s1 + $0x70] sm:$0xff]   ;;  %v1125_v28 = vld [vmem:[%s1398_s1 + $0x78] sm:$0xff]   ;;  %v1129_v41 = vld [vmem:[%s1400_s3] sm:$0xff]  }
   0xe   : > { %1011 = vmatprep.subr.bf16.mxu1 %v1106_v9  ;;  %v1122_v25 = vld [vmem:[%s1398_s1 + $0xf0] sm:$0xff]   ;;  %s984_s15 = sshll.u32 %s1406_s25, 5  ;;  %v1126_v29 = vld [vmem:[%s1398_s1 + $0xf8] sm:$0xff]   ;;  %v1130_v42 = vld [vmem:[%s1400_s3 + $0x8] sm:$0xff]   ;;  %s930_s27 = sshll.u32 %s1406_s25, 3 }
   0xf   : > { %v1123_v26 = vld [vmem:[%s1398_s1 + $0x30] sm:$0xff]   ;;  %s272_s26 = scalar_lea.vmem %s1397_s0, %s984_s15  ;;  %v1127_v30 = vld [vmem:[%s1398_s1 + $0x38] sm:$0xff]   ;;  %v1133_v45 = vld [vmem:[%s1400_s3 + $0x20] sm:$0xff]   ;;  %s276_s30 = scalar_lea.vmem %s1404_s7, %s930_s27 }
  0x10   : > { %990 = vmatpush3.bf16.msra.mxu0 %v1107_v10  ;;  %v1124_v27 = vld [vmem:[%s1398_s1 + $0xb0] sm:$0xff]   ;;  %v1128_v31 = vld [vmem:[%s1398_s1 + $0xb8] sm:$0xff]   ;;  %v279_v32 = vld [vmem:[%s272_s26 + $0x8] sm:$0xff] }
  0x11   : > { %1012 = vmatpush3.bf16.msra.mxu1 %v1108_v11  ;;  %991 = vmatprep.subr.bf16.mxu0 %v1109_v12  ;;  %v281_v33 = vld [vmem:[%s272_s26 + $0x18] sm:$0xff]  ;;  %v278_v34 = vld [vmem:[%s272_s26] sm:$0xff]  ;;  %v283_v35 = vpack.c.bf16 %v279_v32, %v279_v32  ;;  %v280_v38 = vld [vmem:[%s272_s26 + $0x10] sm:$0xff] }
  0x12   : > { %1013 = vmatprep.subr.bf16.mxu1 %v1110_v13  ;;  %v285_v36 = vpack.c.bf16 %v281_v33, %v281_v33  ;;  %v282_v37 = vpack.c.bf16 %v278_v34, %v278_v34  ;;  %v284_v40 = vpack.c.bf16 %v280_v38, %v280_v38  ;;  %v1131_v43 = vld [vmem:[%s1400_s3 + $0x10] sm:$0xff]   ;;  %v1132_v44 = vld [vmem:[%s1400_s3 + $0x18] sm:$0xff]   ;;  %v1134_v46 = vld [vmem:[%s1400_s3 + $0x28] sm:$0xff]  }
  0x13   : > { %581 = vmatprep.mubr.bf16.mxu0 %v283_v35  ;;  %v1135_v47 = vld [vmem:[%s1400_s3 + $0x30] sm:$0xff]   ;;  %v1136_v48 = vld [vmem:[%s1400_s3 + $0x38] sm:$0xff]   ;;  %v1137_v49 = vld [vmem:[%s1402_s5] sm:$0xff]  }
  0x14   : > { %992 = vmatpush3.bf16.msra.mxu0 %v1111_v14  ;;  %621 = vmatprep.mubr.bf16.mxu1 %v285_v36  ;;  %v1138_v50 = vld [vmem:[%s1402_s5 + $0x8] sm:$0xff]   ;;  %v1139_v51 = vld [vmem:[%s1402_s5 + $0x10] sm:$0xff]   ;;  %v1140_v52 = vld [vmem:[%s1402_s5 + $0x18] sm:$0xff]  }
  0x15   : > { %1014 = vmatpush3.bf16.msra.mxu1 %v1112_v15  ;;  %993 = vmatprep.subr.bf16.mxu0 %v1113_v16  ;;  %v1141_v53 = vld [vmem:[%s1402_s5 + $0x20] sm:$0xff]   ;;  %v1142_v54 = vld [vmem:[%s1402_s5 + $0x28] sm:$0xff]   ;;  %v1143_v6 = vld [vmem:[%s1402_s5 + $0x30] sm:$0xff]   ;;  %v855_v16 = vlaneseq }
  0x16   : > { %1015 = vmatprep.subr.bf16.mxu1 %v1114_v17  ;;  %v931_v57 = vld [vmem:[%s1399_s2] ss:$0 sm:$0xff]  ;;  %v1144_v7 = vld [vmem:[%s1402_s5 + $0x38] sm:$0xff]  }
  0x17   : > { %v964_v8 = vld [vmem:[%s1401_s4] ss:$0 sm:$0xff]  ;;  %v856_v17 = vand.u32 127, %v855_v16 }
  0x18   : > { %994 = vmatpush3.bf16.msra.mxu0 %v1115_v18  ;;  %v973_v18 = vld [vmem:[%s1403_s6] ss:$0 sm:$0xff] }
  0x19   : > { %1016 = vmatpush3.bf16.msra.mxu1 %v1116_v19  ;;  %995 = vmatprep.subr.bf16.mxu0 %v1117_v20  ;;  %vm857_vm1 = vcmp.lt.s32.totalorder %v856_v17, 4 }
  0x1a   : > { %1017 = vmatprep.subr.bf16.mxu1 %v1118_v21 }
  0x1c   : > { %996 = vmatpush3.bf16.msra.mxu0 %v1119_v22 }
  0x1d   : > { %1018 = vmatpush3.bf16.msra.mxu1 %v1120_v23  ;;  %997 = vmatprep.subr.bf16.mxu0 %v1121_v24 }
  0x1e   : > { %1019 = vmatprep.subr.bf16.mxu1 %v1122_v25 }
  0x20   : > { %998 = vmatpush3.bf16.msra.mxu0 %v1123_v26 }
  0x21   : > { %1020 = vmatpush3.bf16.msra.mxu1 %v1124_v27  ;;  %999 = vmatprep.subr.bf16.mxu0 %v1125_v28 }
  0x22   : > { %1021 = vmatprep.subr.bf16.mxu1 %v1126_v29 }
  0x24   : > { %1000 = vmatpush3.bf16.msra.mxu0 %v1127_v30 }
  0x25   : > { %1022 = vmatpush3.bf16.msra.mxu1 %v1128_v31  ;;  %1047 = vmatprep.subr.bf16.mxu0 %v1157_v39 }
  0x26   : > { %1067 = vmatprep.subr.bf16.mxu1 %v1157_v39 }
  0x27   : > { %582 = vmatmul.mubr.bf16.vlgmr.msra.gmra.mrb[0].mxu0 %v282_v37 }
  0x28   : > { %622 = vmatmul.mubr.bf16.vlgmr.msra.gmra.mrb[0].mxu1 %v284_v40  ;;  %1048 = vmatpush3.bf16.msra.mxu0 %v1129_v41 }
  0x29   : > { %1049 = vmatprep.subr.bf16.mxu0 %v1157_v39  ;;  %1063 = vmatprep.mubr.msk.bf16.mxu0 %vm1158_vm0, %v1157_v39 }
  0x2a   : > { %1083 = vmatprep.mubr.msk.bf16.mxu1 %vm1158_vm0, %v1157_v39  ;;  %1068 = vmatpush3.bf16.msra.mxu1 %v1137_v49 }
  0x2b   : > { %1069 = vmatprep.subr.bf16.mxu1 %v1157_v39 }
  0x2c   : > { %1050 = vmatpush3.bf16.msra.mxu0 %v1130_v42 }
  0x2d   : > { %1051 = vmatprep.subr.bf16.mxu0 %v1157_v39 }
  0x2e   : > { %1070 = vmatpush3.bf16.msra.mxu1 %v1138_v50 }
  0x2f   : > { %1071 = vmatprep.subr.bf16.mxu1 %v1157_v39 }
  0x30   : > { %1052 = vmatpush3.bf16.msra.mxu0 %v1131_v43 }
  0x31   : > { %1053 = vmatprep.subr.bf16.mxu0 %v1157_v39 }
  0x32   : > { %1072 = vmatpush3.bf16.msra.mxu1 %v1139_v51 }
  0x33   : > { %1073 = vmatprep.subr.bf16.mxu1 %v1157_v39 }
  0x34   : > { %1054 = vmatpush3.bf16.msra.mxu0 %v1132_v44 }
  0x35   : > { %1055 = vmatprep.subr.bf16.mxu0 %v1157_v39 }
  0x36   : > { %1074 = vmatpush3.bf16.msra.mxu1 %v1140_v52 }
  0x37   : > { %1075 = vmatprep.subr.bf16.mxu1 %v1157_v39 }
  0x38   : > { %1056 = vmatpush3.bf16.msra.mxu0 %v1133_v45 }
  0x39   : > { %1057 = vmatprep.subr.bf16.mxu0 %v1157_v39 }
  0x3a   : > { %1076 = vmatpush3.bf16.msra.mxu1 %v1141_v53 }
  0x3b   : > { %1077 = vmatprep.subr.bf16.mxu1 %v1157_v39 }
  0x3c   : > { %1058 = vmatpush3.bf16.msra.mxu0 %v1134_v46 }
  0x3d   : > { %1059 = vmatprep.subr.bf16.mxu0 %v1157_v39 }
  0x3e   : > { %1078 = vmatpush3.bf16.msra.mxu1 %v1142_v54 }
  0x3f   : > { %1079 = vmatprep.subr.bf16.mxu1 %v1157_v39 }
  0x40   : > { %1060 = vmatpush3.bf16.msra.mxu0 %v1135_v47 }
  0x41   : > { %1061 = vmatprep.subr.bf16.mxu0 %v1157_v39 }
  0x42   : > { %1080 = vmatpush3.bf16.msra.mxu1 %v1143_v6 }
  0x43   : > { %1081 = vmatprep.subr.bf16.mxu1 %v1157_v39 }
  0x44   : > { %1062 = vmatpush3.bf16.msra.mxu0 %v1136_v48 }
  0x46   : > { %1082 = vmatpush3.bf16.msra.mxu1 %v1144_v7 }
  0xfa   : > { %v1001_v55 = vpop.f32.mrb[0].mxu0 }
  0xfb   : > { %v1023_v56 = vpop.f32.mrb[0].mxu1  ;;  %v1002_v58 = vpop.f32.mrb[1].mxu0 }
  0xfc   : > { %v1024_v59 = vpop.f32.mrb[1].mxu1  ;;  %v1003_v60 = vadd.f32 %v1002_v58, %v1001_v55  ;;  %v1004_v62 = vpop.f32.mrb[2].mxu0 }
  0xfd   : > { %v1025_v61 = vadd.f32 %v1024_v59, %v1023_v56  ;;  %v1026_v63 = vpop.f32.mrb[2].mxu1  ;;  %v1005_v0 = vpop.f32.mrb[3].mxu0 }
  0xfe   : > { %v1027_v1 = vpop.f32.mrb[3].mxu1  ;;  %v584_v2 = vadd.f32 %v1003_v60, %v931_v57 }
 0x100   : > { %v624_v3 = vadd.f32 %v1025_v61, %v584_v2 }
 0x102   : > { %v629_v4 = vmax.f32 %v624_v3, 0.0 }
 0x104   : > { %v630_v5 = vpack.c.bf16 %v629_v4, %v629_v4 }
 0x106   : > { %1064 = vmatmul.mubr.bf16.vlgmr.msra.gmra.mrb[4].mxu0 %v630_v5 }
 0x1d9   : > { %v736_v9 = vpop.f32.mrb[4].mxu0 }
 0x1da   : > { %v737_v10 = vadd.f32 %v964_v8, %v736_v9  ;;  %v1065_v11 = vpop.f32.mrb[5].mxu0 }
 0x1db   : > { %v739_v12 = vpop.f32.mrb[6].mxu0 }
 0x1dc   : > { %v742_v13 = vmax.f32 %v737_v10, 0.0  ;;  %v1066_v14 = vpop.f32.mrb[7].mxu0 }
 0x1de   : > { %v743_v15 = vpack.c.bf16 %v742_v13, %v742_v13 }
 0x1e0   : > { %1084 = vmatmul.mubr.bf16.vlgmr.msra.gmra.mrb[4].mxu1 %v743_v15 }
 0x2b3   : > { %v849_v19 = vpop.f32.mrb[4].mxu1 }
 0x2b4   : > { %v850_v20 = vadd.f32 %v973_v18, %v849_v19  ;;  %v1085_v21 = vpop.f32.mrb[5].mxu1 }
 0x2b5   : > { %v852_v22 = vpop.f32.mrb[6].mxu1 }
 0x2b6   : > { %v1086_v23 = vpop.f32.mrb[7].mxu1  ;;  %v858_v24 = vsel %vm857_vm1, %v850_v20, -1e+30 }
 0x2b7   : > { %859 = vmax.xlane.f32.xlu0 %v858_v24 }
 0x344   : > { %v860_v25 = vpop.xlane.xlu0 %859 }
 0x345   : > { %v861_v26 = vsub.f32 %v858_v24, %v860_v25 }
 0x347   : > { %v862_v27 = vmul.f32 1.442695, %v861_v26 }
 0x349   : > { %1145 = vpow2.f32 %v862_v27 }
 0x353   : > { %v1146_v28 = vpop.eup %1145 }
 0x354   : > { %864 = vadd.xlane.f32.xlu0 %v1146_v28 }
 0x3e1   : > { %v865_v29 = vpop.xlane.xlu0 %864 }
 0x3e2   : > { %1147 = vrcp.f32 %v865_v29 }
 0x3ec   : > { %v1148_v30 = vpop.eup %1147 }
 0x3ed   : > { %v867_v31 = vmul.f32 %v1148_v30, %v1146_v28 }
 0x3ef   : > { %v868_v32 = vsel %vm857_vm1, %v867_v31, %v850_v20 }
 0x3f0   : > { %869 = vst [vmem:[%s276_s30] sm:$0xff] %v868_v32 }
 0x3f1 PF: > { %s17_s24 = sadd.s32 1, %s1155_s24  }
 0x3f2   : > { %p14_p4 = scmp.ge.s32.totalorder %s17_s24, 4  }
 0x3f4   :  { %16 = sbr.rel (!%p14_p4) target bundleno = 1 (0x1), region = 78 }

</bundles_post_ra>
